<compile_context>
chip_gen: v7x
topology: tpu7x:2x2x1
jax: 0.10.0
libtpu: 0.0.40
codegen_flags: <defaults>
</compile_context>

<pallas_src>
import jax
import jax.numpy as jnp
from jax.experimental import pallas as pl
from jax.experimental.pallas import tpu as pltpu


LAYER_NAMES = ("enc_1", "enc_2", "enc_3", "z_layer",
               "dec_1", "dec_2", "dec_3", "x_bar_layer")


def _round_up(n, m):
    return ((n + m - 1) // m) * m


# ----------------------------------------------------------------------------
# Kernel
# ----------------------------------------------------------------------------
def _ae_kernel(
    x_ref,
    we1_ref, be1_ref, we2_ref, be2_ref, we3_ref, be3_ref,
    wz_ref, bz_ref,
    wd1_ref, bd1_ref, wd2_ref, bd2_ref, wd3_ref, bd3_ref,
    wxb_ref, bxb_ref,
    xbar_ref, h1_ref, h2_ref, h3_ref, z_ref,
):
    compute_dtype = we1_ref.dtype  # bf16 (or f32) — set once in prepare_params

    def linear(a, w_ref, b_ref):
        # MXU matmul in compute_dtype with f32 accumulation; bias add in f32.
        return (
            jnp.dot(a.astype(compute_dtype), w_ref[...],
                    preferred_element_type=jnp.float32)
            + b_ref[...]
        )

    x = x_ref[...]

    enc_h1 = jax.nn.relu(linear(x, we1_ref, be1_ref))
    h1_ref[...] = enc_h1.astype(h1_ref.dtype)          # eager store

    enc_h2 = jax.nn.relu(linear(enc_h1, we2_ref, be2_ref))
    h2_ref[...] = enc_h2.astype(h2_ref.dtype)

    enc_h3 = jax.nn.relu(linear(enc_h2, we3_ref, be3_ref))
    h3_ref[...] = enc_h3.astype(h3_ref.dtype)

    z = linear(enc_h3, wz_ref, bz_ref)
    z_ref[...] = z.astype(z_ref.dtype)

    dec_h1 = jax.nn.relu(linear(z, wd1_ref, bd1_ref))
    dec_h2 = jax.nn.relu(linear(dec_h1, wd2_ref, bd2_ref))
    dec_h3 = jax.nn.relu(linear(dec_h2, wd3_ref, bd3_ref))
    x_bar = linear(dec_h3, wxb_ref, bxb_ref)
    xbar_ref[...] = x_bar.astype(xbar_ref.dtype)


# ----------------------------------------------------------------------------
# Parameter preparation (done ONCE, hoisted out of the forward hot path)
# ----------------------------------------------------------------------------
def prepare_params(params, compute_dtype=jnp.bfloat16):
    """Transpose to (in, out), zero-pad feature dims to multiples of 128 and
    cast weights to the MXU compute dtype.  Biases stay f32 as (1, out_pad).

    params: dict name -> (weight (out, in), bias (out,)) in PyTorch convention.
    Returns (flat_tensors, dims) where dims is a tuple of (in_f, out_f).
    """
    flat = []
    dims = []
    for name in LAYER_NAMES:
        w, b = params[name]
        w = jnp.asarray(w)
        b = jnp.asarray(b)
        out_f, in_f = w.shape
        in_p = _round_up(in_f, 128)
        out_p = _round_up(out_f, 128)
        w_t = jnp.zeros((in_p, out_p), compute_dtype)
        w_t = w_t.at[:in_f, :out_f].set(w.T.astype(compute_dtype))
        b_p = jnp.zeros((1, out_p), jnp.float32)
        b_p = b_p.at[0, :out_f].set(b.astype(jnp.float32))
        flat.append(w_t)
        flat.append(b_p)
        dims.append((in_f, out_f))
    return tuple(flat), tuple(dims)


def _pick_vmem_limit(tb, n_input_p, out_dims_p, dims, flat_params):
    param_bytes = sum(int(p.size) * p.dtype.itemsize for p in flat_params)
    # double-buffered input + output activation tiles (f32)
    io_bytes = 2 * 2 * tb * (n_input_p + sum(out_dims_p)) * 4
    # intermediate activations that the compiler may keep live in VMEM
    inter_bytes = tb * sum(_round_up(o, 128) for _, o in dims) * 4
    needed = param_bytes + io_bytes + inter_bytes + (4 << 20)
    try:
        cap = pltpu.get_tpu_info().vmem_capacity_bytes
    except Exception:
        cap = 64 << 20  # conservative (v7x physical VMEM per TC)
    return int(min(max(needed, 32 << 20), (cap * 3) // 4))


# ----------------------------------------------------------------------------
# Forward
# ----------------------------------------------------------------------------
def ae_forward(x, prepared, *, block_batch=256):
    """Forward pass. `prepared` comes from prepare_params().
    Returns (x_bar, enc_h1, enc_h2, enc_h3, z) — same as the PyTorch module.
    """
    flat_params, dims = prepared
    batch, n_input = x.shape
    assert n_input == dims[0][0], "input feature dim mismatch"

    n_input_p = _round_up(n_input, 128)
    # output order: x_bar, enc_h1, enc_h2, enc_h3, z
    out_dims = (dims[7][1], dims[0][1], dims[1][1], dims[2][1], dims[3][1])
    out_dims_p = tuple(_round_up(d, 128) for d in out_dims)

    # Batch tile: 256 rows (v6e/v7x MXU width); small batches collapse to one
    # sublane-aligned tile.  (On v5e, pass block_batch=128.)
    tb = block_batch
    if batch <= tb:
        tb = max(8, _round_up(batch, 8))
    b_pad = _round_up(batch, tb)
    grid = (b_pad // tb,)

    # Pad batch rows and feature lanes with zeros (sliced off again below),
    # skipping the copy entirely when already aligned.
    if b_pad == batch and n_input_p == n_input:
        x_p = x
    else:
        x_p = jnp.zeros((b_pad, n_input_p), x.dtype).at[:batch, :n_input].set(x)

    def _batch_map(i):
        return (i, 0)

    def _const_map(i):
        return (0, 0)

    in_specs = [pl.BlockSpec((tb, n_input_p), _batch_map)]
    # Weights/biases: full-array blocks, constant index_map -> VMEM-resident.
    for p in flat_params:
        in_specs.append(pl.BlockSpec(p.shape, _const_map))

    out_shape = tuple(
        jax.ShapeDtypeStruct((b_pad, dp), x.dtype) for dp in out_dims_p
    )
    out_specs = tuple(
        pl.BlockSpec((tb, dp), _batch_map) for dp in out_dims_p
    )

    flops = 2 * b_pad * sum(_round_up(i, 128) * _round_up(o, 128) for i, o in dims)
    bytes_accessed = (
        int(x_p.size) * x_p.dtype.itemsize
        + sum(int(p.size) * p.dtype.itemsize for p in flat_params)
        + sum(b_pad * dp * jnp.dtype(x.dtype).itemsize for dp in out_dims_p)
    )

    fn = pl.pallas_call(
        _ae_kernel,
        out_shape=out_shape,
        grid=grid,
        in_specs=in_specs,
        out_specs=out_specs,
        compiler_params=pltpu.CompilerParams(
            dimension_semantics=("parallel",),  # megacore on v7x; no-op v5e/v6e
            vmem_limit_bytes=_pick_vmem_limit(
                tb, n_input_p, out_dims_p, dims, flat_params),
        ),
        cost_estimate=pl.CostEstimate(
            flops=flops, transcendentals=0, bytes_accessed=int(bytes_accessed)),
    )

    xbar_p, h1_p, h2_p, h3_p, z_p = fn(x_p, *flat_params)

    def _slice(a, d):
        if a.shape[0] == batch and a.shape[1] == d:
            return a
        return a[:batch, :d]

    x_bar = _slice(xbar_p, out_dims[0])
    enc_h1 = _slice(h1_p, out_dims[1])
    enc_h2 = _slice(h2_p, out_dims[2])
    enc_h3 = _slice(h3_p, out_dims[3])
    z = _slice(z_p, out_dims[4])
    return x_bar, enc_h1, enc_h2, enc_h3, z


# ----------------------------------------------------------------------------
# Init + references
# ----------------------------------------------------------------------------
def init_params(key, n_enc_1, n_enc_2, n_enc_3, n_dec_1, n_dec_2, n_dec_3,
                n_input, n_z):
    """Deterministic init mimicking PyTorch Linear default (uniform +-1/sqrt(fan_in))."""
    dims = {
        "enc_1": (n_enc_1, n_input),
        "enc_2": (n_enc_2, n_enc_1),
        "enc_3": (n_enc_3, n_enc_2),
        "z_layer": (n_z, n_enc_3),
        "dec_1": (n_dec_1, n_z),
        "dec_2": (n_dec_2, n_dec_1),
        "dec_3": (n_dec_3, n_dec_2),
        "x_bar_layer": (n_input, n_dec_3),
    }
    params = {}
    for name, (out_f, in_f) in dims.items():
        key, kw, kb = jax.random.split(key, 3)
        bound = 1.0 / jnp.sqrt(jnp.float32(in_f))
        w = jax.random.uniform(kw, (out_f, in_f), jnp.float32, -bound, bound)
        b = jax.random.uniform(kb, (out_f,), jnp.float32, -bound, bound)
        params[name] = (w, b)
    return params


def ae_forward_ref(x, params, compute_dtype=None):
    """Pure-JAX reference. compute_dtype=None -> exact PyTorch (f32) semantics;
    compute_dtype=bf16 -> emulates the kernel's bf16-matmul / f32-accumulate path."""
    def lin(a, name):
        w, b = params[name]
        if compute_dtype is not None:
            a = a.astype(compute_dtype)
            w = w.astype(compute_dtype)
        return jnp.dot(a, w.T, preferred_element_type=jnp.float32) + b

    enc_h1 = jax.nn.relu(lin(x, "enc_1"))
    enc_h2 = jax.nn.relu(lin(enc_h1, "enc_2"))
    enc_h3 = jax.nn.relu(lin(enc_h2, "enc_3"))
    z = lin(enc_h3, "z_layer")
    dec_h1 = jax.nn.relu(lin(z, "dec_1"))
    dec_h2 = jax.nn.relu(lin(dec_h1, "dec_2"))
    dec_h3 = jax.nn.relu(lin(dec_h2, "dec_3"))
    x_bar = lin(dec_h3, "x_bar_layer")
    return x_bar, enc_h1, enc_h2, enc_h3, z


if __name__ == "__main__":
    # Small shapes consistent with the module's forward.
    batch = 24
    n_input, n_z = 32, 16
    n_enc_1, n_enc_2, n_enc_3 = 64, 48, 128
    n_dec_1, n_dec_2, n_dec_3 = 128, 48, 64

    key = jax.random.PRNGKey(0)
    key, kx = jax.random.split(key)
    x = jax.random.normal(kx, (batch, n_input), jnp.float32)

    params = init_params(key, n_enc_1, n_enc_2, n_enc_3,
                         n_dec_1, n_dec_2, n_dec_3, n_input, n_z)

    # One-time parameter prep (transpose + pad + bf16 cast), hoisted out of the
    # per-step forward.
    prepared = prepare_params(params, compute_dtype=jnp.bfloat16)

    # block_batch=8 at this toy size exercises a multi-step parallel grid with
    # VMEM-resident weights; at real SDCN sizes use 256 (v6e/v7x) or 128 (v5e).
    outs = ae_forward(x, prepared, block_batch=8)
    outs = jax.block_until_ready(outs)

    # Tight check vs. a reference that emulates the kernel numerics (bf16 MXU
    # inputs, f32 accumulation).
    refs_bf16 = ae_forward_ref(x, params, compute_dtype=jnp.bfloat16)
    # Loose check vs. the exact f32 PyTorch-semantics reference.
    refs_f32 = ae_forward_ref(x, params, compute_dtype=None)

    for o, rb, rf in zip(outs, refs_bf16, refs_f32):
        assert o.shape == rf.shape and o.dtype == rf.dtype
        assert jnp.allclose(o, rb, atol=1e-2, rtol=1e-2), "kernel != bf16 ref"
        assert jnp.allclose(o, rf, atol=5e-2, rtol=5e-2), "kernel != f32 ref"

    print("KERNEL_OK")
</pallas_src>

<mosaic_0001>
module attributes {stable_mosaic.version = 11 : i64} {
  func.func @_ae_kernel(%arg0: i32, %arg1: memref<8x128xf32, #tpu.memory_space<vmem>>, %arg2: memref<128x128xbf16, #tpu.memory_space<vmem>>, %arg3: memref<1x128xf32, #tpu.memory_space<vmem>>, %arg4: memref<128x128xbf16, #tpu.memory_space<vmem>>, %arg5: memref<1x128xf32, #tpu.memory_space<vmem>>, %arg6: memref<128x128xbf16, #tpu.memory_space<vmem>>, %arg7: memref<1x128xf32, #tpu.memory_space<vmem>>, %arg8: memref<128x128xbf16, #tpu.memory_space<vmem>>, %arg9: memref<1x128xf32, #tpu.memory_space<vmem>>, %arg10: memref<128x128xbf16, #tpu.memory_space<vmem>>, %arg11: memref<1x128xf32, #tpu.memory_space<vmem>>, %arg12: memref<128x128xbf16, #tpu.memory_space<vmem>>, %arg13: memref<1x128xf32, #tpu.memory_space<vmem>>, %arg14: memref<128x128xbf16, #tpu.memory_space<vmem>>, %arg15: memref<1x128xf32, #tpu.memory_space<vmem>>, %arg16: memref<128x128xbf16, #tpu.memory_space<vmem>>, %arg17: memref<1x128xf32, #tpu.memory_space<vmem>>, %arg18: memref<8x128xf32, #tpu.memory_space<vmem>>, %arg19: memref<8x128xf32, #tpu.memory_space<vmem>>, %arg20: memref<8x128xf32, #tpu.memory_space<vmem>>, %arg21: memref<8x128xf32, #tpu.memory_space<vmem>>, %arg22: memref<8x128xf32, #tpu.memory_space<vmem>>) attributes {dimension_semantics = [#tpu.dimension_semantics<parallel>], iteration_bounds = array<i64: 3>, scalar_prefetch = 0 : i64, scratch_operands = 0 : i64, tpu.core_type = #tpu.core_type<tc>, window_params = [{transform_indices = @transform_0, window_bounds = array<i64: 8, 128>}, {pipeline_mode = #tpu.pipeline_mode<synchronous>, transform_indices = @transform_1, window_bounds = array<i64: 128, 128>}, {pipeline_mode = #tpu.pipeline_mode<synchronous>, transform_indices = @transform_2, window_bounds = array<i64: 1, 128>}, {pipeline_mode = #tpu.pipeline_mode<synchronous>, transform_indices = @transform_3, window_bounds = array<i64: 128, 128>}, {pipeline_mode = #tpu.pipeline_mode<synchronous>, transform_indices = @transform_4, window_bounds = array<i64: 1, 128>}, {pipeline_mode = #tpu.pipeline_mode<synchronous>, transform_indices = @transform_5, window_bounds = array<i64: 128, 128>}, {pipeline_mode = #tpu.pipeline_mode<synchronous>, transform_indices = @transform_6, window_bounds = array<i64: 1, 128>}, {pipeline_mode = #tpu.pipeline_mode<synchronous>, transform_indices = @transform_7, window_bounds = array<i64: 128, 128>}, {pipeline_mode = #tpu.pipeline_mode<synchronous>, transform_indices = @transform_8, window_bounds = array<i64: 1, 128>}, {pipeline_mode = #tpu.pipeline_mode<synchronous>, transform_indices = @transform_9, window_bounds = array<i64: 128, 128>}, {pipeline_mode = #tpu.pipeline_mode<synchronous>, transform_indices = @transform_10, window_bounds = array<i64: 1, 128>}, {pipeline_mode = #tpu.pipeline_mode<synchronous>, transform_indices = @transform_11, window_bounds = array<i64: 128, 128>}, {pipeline_mode = #tpu.pipeline_mode<synchronous>, transform_indices = @transform_12, window_bounds = array<i64: 1, 128>}, {pipeline_mode = #tpu.pipeline_mode<synchronous>, transform_indices = @transform_13, window_bounds = array<i64: 128, 128>}, {pipeline_mode = #tpu.pipeline_mode<synchronous>, transform_indices = @transform_14, window_bounds = array<i64: 1, 128>}, {pipeline_mode = #tpu.pipeline_mode<synchronous>, transform_indices = @transform_15, window_bounds = array<i64: 128, 128>}, {pipeline_mode = #tpu.pipeline_mode<synchronous>, transform_indices = @transform_16, window_bounds = array<i64: 1, 128>}, {transform_indices = @transform_17, window_bounds = array<i64: 8, 128>}, {transform_indices = @transform_18, window_bounds = array<i64: 8, 128>}, {transform_indices = @transform_19, window_bounds = array<i64: 8, 128>}, {transform_indices = @transform_20, window_bounds = array<i64: 8, 128>}, {transform_indices = @transform_21, window_bounds = array<i64: 8, 128>}]} {
    %c0 = arith.constant 0 : index
    %c0_0 = arith.constant 0 : index
    %0 = vector.load %arg1[%c0, %c0_0] : memref<8x128xf32, #tpu.memory_space<vmem>>, vector<8x128xf32>
    %1 = arith.truncf %0 : vector<8x128xf32> to vector<8x128xbf16>
    %c0_1 = arith.constant 0 : index
    %c0_2 = arith.constant 0 : index
    %2 = vector.load %arg2[%c0_1, %c0_2] : memref<128x128xbf16, #tpu.memory_space<vmem>>, vector<128x128xbf16>
    %cst = arith.constant dense<0.000000e+00> : vector<8x128xf32>
    %3 = tpu.matmul %1, %2, %cst {dimension_numbers = #tpu.dot_dimension_numbers<[1], [0], [0], [1], [0, 0, 1, 1], [], []>} : vector<8x128xbf16>, vector<128x128xbf16>, vector<8x128xf32> -> vector<8x128xf32>
    %c0_3 = arith.constant 0 : index
    %c0_4 = arith.constant 0 : index
    %4 = vector.load %arg3[%c0_3, %c0_4] : memref<1x128xf32, #tpu.memory_space<vmem>>, vector<1x128xf32>
    %5 = vector.broadcast %4 : vector<1x128xf32> to vector<8x128xf32>
    %6 = arith.addf %3, %5 : vector<8x128xf32>
    %cst_5 = arith.constant 0.000000e+00 : f32
    %7 = vector.broadcast %cst_5 : f32 to vector<8x128xf32>
    %8 = arith.maximumf %6, %7 : vector<8x128xf32>
    %c0_6 = arith.constant 0 : index
    %c0_7 = arith.constant 0 : index
    %9 = vector.load %arg19[%c0_6, %c0_7] : memref<8x128xf32, #tpu.memory_space<vmem>>, vector<8x128xf32>
    tpu.vector_store %arg19[%c0_6, %c0_7], %8 {strides = array<i32>} : memref<8x128xf32, #tpu.memory_space<vmem>>, vector<8x128xf32>,
    %10 = arith.truncf %8 : vector<8x128xf32> to vector<8x128xbf16>
    %c0_8 = arith.constant 0 : index
    %c0_9 = arith.constant 0 : index
    %11 = vector.load %arg4[%c0_8, %c0_9] : memref<128x128xbf16, #tpu.memory_space<vmem>>, vector<128x128xbf16>
    %cst_10 = arith.constant dense<0.000000e+00> : vector<8x128xf32>
    %12 = tpu.matmul %10, %11, %cst_10 {dimension_numbers = #tpu.dot_dimension_numbers<[1], [0], [0], [1], [0, 0, 1, 1], [], []>} : vector<8x128xbf16>, vector<128x128xbf16>, vector<8x128xf32> -> vector<8x128xf32>
    %c0_11 = arith.constant 0 : index
    %c0_12 = arith.constant 0 : index
    %13 = vector.load %arg5[%c0_11, %c0_12] : memref<1x128xf32, #tpu.memory_space<vmem>>, vector<1x128xf32>
    %14 = vector.broadcast %13 : vector<1x128xf32> to vector<8x128xf32>
    %15 = arith.addf %12, %14 : vector<8x128xf32>
    %cst_13 = arith.constant 0.000000e+00 : f32
    %16 = vector.broadcast %cst_13 : f32 to vector<8x128xf32>
    %17 = arith.maximumf %15, %16 : vector<8x128xf32>
    %c0_14 = arith.constant 0 : index
    %c0_15 = arith.constant 0 : index
    %18 = vector.load %arg20[%c0_14, %c0_15] : memref<8x128xf32, #tpu.memory_space<vmem>>, vector<8x128xf32>
    tpu.vector_store %arg20[%c0_14, %c0_15], %17 {strides = array<i32>} : memref<8x128xf32, #tpu.memory_space<vmem>>, vector<8x128xf32>,
    %19 = arith.truncf %17 : vector<8x128xf32> to vector<8x128xbf16>
    %c0_16 = arith.constant 0 : index
    %c0_17 = arith.constant 0 : index
    %20 = vector.load %arg6[%c0_16, %c0_17] : memref<128x128xbf16, #tpu.memory_space<vmem>>, vector<128x128xbf16>
    %cst_18 = arith.constant dense<0.000000e+00> : vector<8x128xf32>
    %21 = tpu.matmul %19, %20, %cst_18 {dimension_numbers = #tpu.dot_dimension_numbers<[1], [0], [0], [1], [0, 0, 1, 1], [], []>} : vector<8x128xbf16>, vector<128x128xbf16>, vector<8x128xf32> -> vector<8x128xf32>
    %c0_19 = arith.constant 0 : index
    %c0_20 = arith.constant 0 : index
    %22 = vector.load %arg7[%c0_19, %c0_20] : memref<1x128xf32, #tpu.memory_space<vmem>>, vector<1x128xf32>
    %23 = vector.broadcast %22 : vector<1x128xf32> to vector<8x128xf32>
    %24 = arith.addf %21, %23 : vector<8x128xf32>
    %cst_21 = arith.constant 0.000000e+00 : f32
    %25 = vector.broadcast %cst_21 : f32 to vector<8x128xf32>
    %26 = arith.maximumf %24, %25 : vector<8x128xf32>
    %c0_22 = arith.constant 0 : index
    %c0_23 = arith.constant 0 : index
    %27 = vector.load %arg21[%c0_22, %c0_23] : memref<8x128xf32, #tpu.memory_space<vmem>>, vector<8x128xf32>
    tpu.vector_store %arg21[%c0_22, %c0_23], %26 {strides = array<i32>} : memref<8x128xf32, #tpu.memory_space<vmem>>, vector<8x128xf32>,
    %28 = arith.truncf %26 : vector<8x128xf32> to vector<8x128xbf16>
    %c0_24 = arith.constant 0 : index
    %c0_25 = arith.constant 0 : index
    %29 = vector.load %arg8[%c0_24, %c0_25] : memref<128x128xbf16, #tpu.memory_space<vmem>>, vector<128x128xbf16>
    %cst_26 = arith.constant dense<0.000000e+00> : vector<8x128xf32>
    %30 = tpu.matmul %28, %29, %cst_26 {dimension_numbers = #tpu.dot_dimension_numbers<[1], [0], [0], [1], [0, 0, 1, 1], [], []>} : vector<8x128xbf16>, vector<128x128xbf16>, vector<8x128xf32> -> vector<8x128xf32>
    %c0_27 = arith.constant 0 : index
    %c0_28 = arith.constant 0 : index
    %31 = vector.load %arg9[%c0_27, %c0_28] : memref<1x128xf32, #tpu.memory_space<vmem>>, vector<1x128xf32>
    %32 = vector.broadcast %31 : vector<1x128xf32> to vector<8x128xf32>
    %33 = arith.addf %30, %32 : vector<8x128xf32>
    %c0_29 = arith.constant 0 : index
    %c0_30 = arith.constant 0 : index
    %34 = vector.load %arg22[%c0_29, %c0_30] : memref<8x128xf32, #tpu.memory_space<vmem>>, vector<8x128xf32>
    tpu.vector_store %arg22[%c0_29, %c0_30], %33 {strides = array<i32>} : memref<8x128xf32, #tpu.memory_space<vmem>>, vector<8x128xf32>,
    %35 = arith.truncf %33 : vector<8x128xf32> to vector<8x128xbf16>
    %c0_31 = arith.constant 0 : index
    %c0_32 = arith.constant 0 : index
    %36 = vector.load %arg10[%c0_31, %c0_32] : memref<128x128xbf16, #tpu.memory_space<vmem>>, vector<128x128xbf16>
    %cst_33 = arith.constant dense<0.000000e+00> : vector<8x128xf32>
    %37 = tpu.matmul %35, %36, %cst_33 {dimension_numbers = #tpu.dot_dimension_numbers<[1], [0], [0], [1], [0, 0, 1, 1], [], []>} : vector<8x128xbf16>, vector<128x128xbf16>, vector<8x128xf32> -> vector<8x128xf32>
    %c0_34 = arith.constant 0 : index
    %c0_35 = arith.constant 0 : index
    %38 = vector.load %arg11[%c0_34, %c0_35] : memref<1x128xf32, #tpu.memory_space<vmem>>, vector<1x128xf32>
    %39 = vector.broadcast %38 : vector<1x128xf32> to vector<8x128xf32>
    %40 = arith.addf %37, %39 : vector<8x128xf32>
    %cst_36 = arith.constant 0.000000e+00 : f32
    %41 = vector.broadcast %cst_36 : f32 to vector<8x128xf32>
    %42 = arith.maximumf %40, %41 : vector<8x128xf32>
    %43 = arith.truncf %42 : vector<8x128xf32> to vector<8x128xbf16>
    %c0_37 = arith.constant 0 : index
    %c0_38 = arith.constant 0 : index
    %44 = vector.load %arg12[%c0_37, %c0_38] : memref<128x128xbf16, #tpu.memory_space<vmem>>, vector<128x128xbf16>
    %cst_39 = arith.constant dense<0.000000e+00> : vector<8x128xf32>
    %45 = tpu.matmul %43, %44, %cst_39 {dimension_numbers = #tpu.dot_dimension_numbers<[1], [0], [0], [1], [0, 0, 1, 1], [], []>} : vector<8x128xbf16>, vector<128x128xbf16>, vector<8x128xf32> -> vector<8x128xf32>
    %c0_40 = arith.constant 0 : index
    %c0_41 = arith.constant 0 : index
    %46 = vector.load %arg13[%c0_40, %c0_41] : memref<1x128xf32, #tpu.memory_space<vmem>>, vector<1x128xf32>
    %47 = vector.broadcast %46 : vector<1x128xf32> to vector<8x128xf32>
    %48 = arith.addf %45, %47 : vector<8x128xf32>
    %cst_42 = arith.constant 0.000000e+00 : f32
    %49 = vector.broadcast %cst_42 : f32 to vector<8x128xf32>
    %50 = arith.maximumf %48, %49 : vector<8x128xf32>
    %51 = arith.truncf %50 : vector<8x128xf32> to vector<8x128xbf16>
    %c0_43 = arith.constant 0 : index
    %c0_44 = arith.constant 0 : index
    %52 = vector.load %arg14[%c0_43, %c0_44] : memref<128x128xbf16, #tpu.memory_space<vmem>>, vector<128x128xbf16>
    %cst_45 = arith.constant dense<0.000000e+00> : vector<8x128xf32>
    %53 = tpu.matmul %51, %52, %cst_45 {dimension_numbers = #tpu.dot_dimension_numbers<[1], [0], [0], [1], [0, 0, 1, 1], [], []>} : vector<8x128xbf16>, vector<128x128xbf16>, vector<8x128xf32> -> vector<8x128xf32>
    %c0_46 = arith.constant 0 : index
    %c0_47 = arith.constant 0 : index
    %54 = vector.load %arg15[%c0_46, %c0_47] : memref<1x128xf32, #tpu.memory_space<vmem>>, vector<1x128xf32>
    %55 = vector.broadcast %54 : vector<1x128xf32> to vector<8x128xf32>
    %56 = arith.addf %53, %55 : vector<8x128xf32>
    %cst_48 = arith.constant 0.000000e+00 : f32
    %57 = vector.broadcast %cst_48 : f32 to vector<8x128xf32>
    %58 = arith.maximumf %56, %57 : vector<8x128xf32>
    %59 = arith.truncf %58 : vector<8x128xf32> to vector<8x128xbf16>
    %c0_49 = arith.constant 0 : index
    %c0_50 = arith.constant 0 : index
    %60 = vector.load %arg16[%c0_49, %c0_50] : memref<128x128xbf16, #tpu.memory_space<vmem>>, vector<128x128xbf16>
    %cst_51 = arith.constant dense<0.000000e+00> : vector<8x128xf32>
    %61 = tpu.matmul %59, %60, %cst_51 {dimension_numbers = #tpu.dot_dimension_numbers<[1], [0], [0], [1], [0, 0, 1, 1], [], []>} : vector<8x128xbf16>, vector<128x128xbf16>, vector<8x128xf32> -> vector<8x128xf32>
    %c0_52 = arith.constant 0 : index
    %c0_53 = arith.constant 0 : index
    %62 = vector.load %arg17[%c0_52, %c0_53] : memref<1x128xf32, #tpu.memory_space<vmem>>, vector<1x128xf32>
    %63 = vector.broadcast %62 : vector<1x128xf32> to vector<8x128xf32>
    %64 = arith.addf %61, %63 : vector<8x128xf32>
    %c0_54 = arith.constant 0 : index
    %c0_55 = arith.constant 0 : index
    %65 = vector.load %arg18[%c0_54, %c0_55] : memref<8x128xf32, #tpu.memory_space<vmem>>, vector<8x128xf32>
    tpu.vector_store %arg18[%c0_54, %c0_55], %64 {strides = array<i32>} : memref<8x128xf32, #tpu.memory_space<vmem>>, vector<8x128xf32>,
    return
  }
  func.func @transform_0(%arg0: i32) -> (i32, i32) {
    %c0_i32 = arith.constant 0 : i32
    %c0_i32_0 = arith.constant 0 : i32
    return %arg0, %c0_i32 : i32, i32
  }
  func.func @transform_1(%arg0: i32) -> (i32, i32) {
    %c0_i32 = arith.constant 0 : i32
    %c0_i32_0 = arith.constant 0 : i32
    %c0_i32_1 = arith.constant 0 : i32
    return %c0_i32, %c0_i32_0 : i32, i32
  }
  func.func @transform_2(%arg0: i32) -> (i32, i32) {
    %c0_i32 = arith.constant 0 : i32
    %c0_i32_0 = arith.constant 0 : i32
    %c0_i32_1 = arith.constant 0 : i32
    return %c0_i32, %c0_i32_0 : i32, i32
  }
  func.func @transform_3(%arg0: i32) -> (i32, i32) {
    %c0_i32 = arith.constant 0 : i32
    %c0_i32_0 = arith.constant 0 : i32
    %c0_i32_1 = arith.constant 0 : i32
    return %c0_i32, %c0_i32_0 : i32, i32
  }
  func.func @transform_4(%arg0: i32) -> (i32, i32) {
    %c0_i32 = arith.constant 0 : i32
    %c0_i32_0 = arith.constant 0 : i32
    %c0_i32_1 = arith.constant 0 : i32
    return %c0_i32, %c0_i32_0 : i32, i32
  }
  func.func @transform_5(%arg0: i32) -> (i32, i32) {
    %c0_i32 = arith.constant 0 : i32
    %c0_i32_0 = arith.constant 0 : i32
    %c0_i32_1 = arith.constant 0 : i32
    return %c0_i32, %c0_i32_0 : i32, i32
  }
  func.func @transform_6(%arg0: i32) -> (i32, i32) {
    %c0_i32 = arith.constant 0 : i32
    %c0_i32_0 = arith.constant 0 : i32
    %c0_i32_1 = arith.constant 0 : i32
    return %c0_i32, %c0_i32_0 : i32, i32
  }
  func.func @transform_7(%arg0: i32) -> (i32, i32) {
    %c0_i32 = arith.constant 0 : i32
    %c0_i32_0 = arith.constant 0 : i32
    %c0_i32_1 = arith.constant 0 : i32
    return %c0_i32, %c0_i32_0 : i32, i32
  }
  func.func @transform_8(%arg0: i32) -> (i32, i32) {
    %c0_i32 = arith.constant 0 : i32
    %c0_i32_0 = arith.constant 0 : i32
    %c0_i32_1 = arith.constant 0 : i32
    return %c0_i32, %c0_i32_0 : i32, i32
  }
  func.func @transform_9(%arg0: i32) -> (i32, i32) {
    %c0_i32 = arith.constant 0 : i32
    %c0_i32_0 = arith.constant 0 : i32
    %c0_i32_1 = arith.constant 0 : i32
    return %c0_i32, %c0_i32_0 : i32, i32
  }
  func.func @transform_10(%arg0: i32) -> (i32, i32) {
    %c0_i32 = arith.constant 0 : i32
    %c0_i32_0 = arith.constant 0 : i32
    %c0_i32_1 = arith.constant 0 : i32
    return %c0_i32, %c0_i32_0 : i32, i32
  }
  func.func @transform_11(%arg0: i32) -> (i32, i32) {
    %c0_i32 = arith.constant 0 : i32
    %c0_i32_0 = arith.constant 0 : i32
    %c0_i32_1 = arith.constant 0 : i32
    return %c0_i32, %c0_i32_0 : i32, i32
  }
  func.func @transform_12(%arg0: i32) -> (i32, i32) {
    %c0_i32 = arith.constant 0 : i32
    %c0_i32_0 = arith.constant 0 : i32
    %c0_i32_1 = arith.constant 0 : i32
    return %c0_i32, %c0_i32_0 : i32, i32
  }
  func.func @transform_13(%arg0: i32) -> (i32, i32) {
    %c0_i32 = arith.constant 0 : i32
    %c0_i32_0 = arith.constant 0 : i32
    %c0_i32_1 = arith.constant 0 : i32
    return %c0_i32, %c0_i32_0 : i32, i32
  }
  func.func @transform_14(%arg0: i32) -> (i32, i32) {
    %c0_i32 = arith.constant 0 : i32
    %c0_i32_0 = arith.constant 0 : i32
    %c0_i32_1 = arith.constant 0 : i32
    return %c0_i32, %c0_i32_0 : i32, i32
  }
  func.func @transform_15(%arg0: i32) -> (i32, i32) {
    %c0_i32 = arith.constant 0 : i32
    %c0_i32_0 = arith.constant 0 : i32
    %c0_i32_1 = arith.constant 0 : i32
    return %c0_i32, %c0_i32_0 : i32, i32
  }
  func.func @transform_16(%arg0: i32) -> (i32, i32) {
    %c0_i32 = arith.constant 0 : i32
    %c0_i32_0 = arith.constant 0 : i32
    %c0_i32_1 = arith.constant 0 : i32
    return %c0_i32, %c0_i32_0 : i32, i32
  }
  func.func @transform_17(%arg0: i32) -> (i32, i32) {
    %c0_i32 = arith.constant 0 : i32
    %c0_i32_0 = arith.constant 0 : i32
    return %arg0, %c0_i32 : i32, i32
  }
  func.func @transform_18(%arg0: i32) -> (i32, i32) {
    %c0_i32 = arith.constant 0 : i32
    %c0_i32_0 = arith.constant 0 : i32
    return %arg0, %c0_i32 : i32, i32
  }
  func.func @transform_19(%arg0: i32) -> (i32, i32) {
    %c0_i32 = arith.constant 0 : i32
    %c0_i32_0 = arith.constant 0 : i32
    return %arg0, %c0_i32 : i32, i32
  }
  func.func @transform_20(%arg0: i32) -> (i32, i32) {
    %c0_i32 = arith.constant 0 : i32
    %c0_i32_0 = arith.constant 0 : i32
    return %arg0, %c0_i32 : i32, i32
  }
  func.func @transform_21(%arg0: i32) -> (i32, i32) {
    %c0_i32 = arith.constant 0 : i32
    %c0_i32_0 = arith.constant 0 : i32
    return %arg0, %c0_i32 : i32, i32
  }
}

</mosaic_0001>

<bundles_post_ra>
// kernel: tpu_custom_call.1
= control target key start
LH: loop header
LB: loop body
LE: loop exit
PB: predicated region body
PF: predicated region fallthrough
CT: control target
= control target key end

     0   :  { %s3864_s0 = inlined_call_operand.hbm [shape: f32[24,128], index: 0, kind: input, shape index: {}]   ;;  %s3865_s1 = inlined_call_operand.hbm [shape: bf16[128,128], index: 1, kind: input, shape index: {}]   ;;  %s3866_s2 = inlined_call_operand.vmem [shape: f32[1,128], index: 2, kind: input, shape index: {}]   ;;  %s3867_s3 = inlined_call_operand.hbm [shape: bf16[128,128], index: 3, kind: input, shape index: {}]   ;;  %s3868_s4 = inlined_call_operand.vmem [shape: f32[1,128], index: 4, kind: input, shape index: {}]   ;;  %s3869_s5 = inlined_call_operand.hbm [shape: bf16[128,128], index: 5, kind: input, shape index: {}]   ;;  %s3870_s6 = inlined_call_operand.vmem [shape: f32[1,128], index: 6, kind: input, shape index: {}]   ;;  %s3871_s7 = inlined_call_operand.hbm [shape: bf16[128,128], index: 7, kind: input, shape index: {}]   ;;  %s3872_s8 = inlined_call_operand.vmem [shape: f32[1,128], index: 8, kind: input, shape index: {}]   ;;  %s3873_s9 = inlined_call_operand.hbm [shape: bf16[128,128], index: 9, kind: input, shape index: {}]   ;;  %s3874_s10 = inlined_call_operand.vmem [shape: f32[1,128], index: 10, kind: input, shape index: {}]   ;;  %s3875_s11 = inlined_call_operand.hbm [shape: bf16[128,128], index: 11, kind: input, shape index: {}]   ;;  %s3876_s12 = inlined_call_operand.vmem [shape: f32[1,128], index: 12, kind: input, shape index: {}]   ;;  %s3877_s13 = inlined_call_operand.hbm [shape: bf16[128,128], index: 13, kind: input, shape index: {}]   ;;  %s3878_s14 = inlined_call_operand.vmem [shape: f32[1,128], index: 14, kind: input, shape index: {}]   ;;  %s3879_s15 = inlined_call_operand.hbm [shape: bf16[128,128], index: 15, kind: input, shape index: {}]   ;;  %s3880_s16 = inlined_call_operand.vmem [shape: f32[1,128], index: 16, kind: input, shape index: {}]   ;;  %s3881_s17 = inlined_call_operand.hbm [shape: f32[24,128], index: 17, kind: output, shape index: {0}]   ;;  %s3882_s18 = inlined_call_operand.hbm [shape: f32[24,128], index: 18, kind: output, shape index: {1}]   ;;  %s3883_s19 = inlined_call_operand.hbm [shape: f32[24,128], index: 19, kind: output, shape index: {2}]   ;;  %s3884_s20 = inlined_call_operand.hbm [shape: f32[24,128], index: 20, kind: output, shape index: {3}]   ;;  %s3885_s21 = inlined_call_operand.hbm [shape: f32[24,128], index: 21, kind: output, shape index: {4}]  }
   0x1   :  { %3906 = sst [smem:[#allocation32_spill]] %s3864_s0 }
   0x2   :  { %3907 = sst [smem:[#allocation33_spill]] %s3865_s1 }
   0x3   :  { %3908 = sst [smem:[#allocation34_spill]] %s3866_s2 }
   0x4   :  { %3909 = sst [smem:[#allocation35_spill]] %s3867_s3 }
   0x5   :  { %3910 = sst [smem:[#allocation36_spill]] %s3868_s4 }
   0x6   :  { %3911 = sst [smem:[#allocation37_spill]] %s3869_s5 }
   0x7   :  { %3912 = sst [smem:[#allocation38_spill]] %s3870_s6 }
   0x8   :  { %3913 = sst [smem:[#allocation39_spill]] %s3871_s7 }
   0x9   :  { %3914 = sst [smem:[#allocation40_spill]] %s3872_s8 }
   0xa   :  { %3915 = sst [smem:[#allocation41_spill]] %s3873_s9 }
   0xb   :  { %3916 = sst [smem:[#allocation42_spill]] %s3874_s10 }
   0xc   :  { %3917 = sst [smem:[#allocation43_spill]] %s3875_s11 }
   0xd   :  { %3918 = sst [smem:[#allocation44_spill]] %s3876_s12 }
   0xe   :  { %3919 = sst [smem:[#allocation45_spill]] %s3877_s13 }
   0xf   :  { %3920 = sst [smem:[#allocation46_spill]] %s3878_s14 }
  0x10   :  { %3921 = sst [smem:[#allocation47_spill]] %s3879_s15 }
  0x11   :  { %3922 = sst [smem:[#allocation48_spill]] %s3880_s16 }
  0x12   :  { %3923 = sst [smem:[#allocation49_spill]] %s3881_s17 }
  0x13   :  { %3924 = sst [smem:[#allocation50_spill]] %s3882_s18 }
  0x14   :  { %3925 = sst [smem:[#allocation51_spill]] %s3883_s19 }
  0x15   :  { %3926 = sst [smem:[#allocation52_spill]] %s3884_s20 }
  0x16   :  { %3927 = sst [smem:[#allocation53_spill]] %s3885_s21 }
  0x17   :  { %27 = vsyncpa [#allocation3], 0 }
  0x18   :  { %29 = vsyncpa [#allocation3 + $0x1], 0 }
  0x19   :  { %30 = vsyncpa [#allocation6], 0 }
  0x1a   :  { %31 = vsyncpa [#allocation9], 0 }
  0x1b   :  { %32 = vsyncpa [#allocation12], 0 }
  0x1c   :  { %33 = vsyncpa [#allocation15], 0 }
  0x1d   :  { %34 = vsyncpa [#allocation4], 0 }
  0x1e   :  { %36 = vsyncpa [#allocation4 + $0x1], 0 }
  0x1f   :  { %37 = vsyncpa [#allocation19], 0 }
  0x20   :  { %39 = vsyncpa [#allocation19 + $0x1], 0 }
  0x21   :  { %40 = vsyncpa [#allocation22], 0 }
  0x22   :  { %42 = vsyncpa [#allocation22 + $0x1], 0  ;;  %s3231_s2 = smov 0   ;;  %s3233_s25 = smov 0  }
  0x23   :  { %s3235_s26 = smov 0   ;;  %s3237_s27 = smov 0  }
  0x24 LB: > { %s3103_s3 = smov [#allocation5]   ;;  %s3252_s29 = sadd.s32 4294967295, %s3101_s27   ;;  %s3101_s27 = sphi %s3237_s27, %s3978_s27   ;;  %s3097_s26 = sphi %s3235_s26, %s3977_s26   ;;  %s3093_s25 = sphi %s3233_s25, %s3976_s25   ;;  %s3089_s2 = sphi %s3231_s2, %s3975_s2  }
  0x25   : > { %s557_s28 = sshll.u32 %s3103_s3, 4  ;;  %p2087_p0 = scmp.ge.s32.totalorder %s3101_s27, 1  ;;  %s3257_s28 = int_to_ptr.vmem [resolvable:$true] %s557_s28 }
  0x26   : > { %p3896_p1 = scmp.eq.s32.totalorder %s3252_s29, 0  ;;  %p545_p2 = scmp.lt.s32.totalorder %s3101_s27, 4 }
  0x27   : > { %s3104_s4 = smov [#allocation8]   ;;  %s3105_s22 = smov [#allocation11]  }
  0x28   : > { %p3259_p3 = pnand %p2087_p0, %p545_p2  ;;  %s589_s30 = sshll.u32 %s3104_s4, 4  ;;  %s3271_s30 = int_to_ptr.vmem [resolvable:$true] %s589_s30 }
  0x29   : > { %s621_s23 = sshll.u32 %s3105_s22, 4  ;;  %s3930_s3 = sld [smem:[#allocation33_spill]]  ;;  %s3273_s23 = int_to_ptr.vmem [resolvable:$true] %s621_s23 }
  0x2a   : > { %s3928_s0 = scalar_select %p3259_p3, 1, 0 }
  0x2b   : > { %p2474_p4 = pneg %p3259_p3 }
  0x2d   : > { %p3267_p5 = pnand %p2474_p4, %p3896_p1 }
  0x2f   : > { %s2645_s17 = scalar_lea.hbm %s3930_s3, 1024  ;;  %p3283_p7 = pneg %p3267_p5 }
  0x30   : > { %p2646_p6 = scmp.ne.s32.totalorder %s3930_s3, %s2645_s17  ;;  %p2652_p10 = scmp.lt.u32.totalorder %s2645_s17, %s3930_s3 }
  0x32   : > { %p2648_p8 = pnand %p3283_p7, %p2646_p6 }
  0x34   : > { %p2649_p9 = pneg %p2648_p8 }
  0x36   : > { %p2654_p11 = pnand %p2652_p10, %p2649_p9 }
  0x38   : > { %2657 = shalt.err (!%p2654_p11)
}
  0x39   : > { %s2658_s16 = scalar_lea.vmem %s3257_s28, 1024  ;;  %p2666_p2 = scmp.lt.s32.totalorder %s3257_s28, %s3257_s28 }
  0x3a   : > { %p2659_p12 = scmp.ne.s32.totalorder %s3257_s28, %s2658_s16  ;;  %p2667_p4 = scmp.lt.s32.totalorder %s2658_s16, %s2658_s16 }
  0x3c   : > { %p2661_p13 = pnand %p2659_p12, %p3283_p7  ;;  %p2668_p6 = por %p2667_p4, %p2666_p2 }
  0x3e   : > { %p2662_p0 = pneg %p2661_p13 }
  0x40   : > { %p2669_p8 = pnand %p2668_p6, %p2662_p0 }
  0x42   : > { %2672 = shalt.err (!%p2669_p8)
}
  0x43   : > { %s3106_s21 = smov 64   ;;  %s3107_s17 = smov 4  }
  0x44   : > { %2477 = dma.hbm_to_vmem [thread:$0]  (!%p3267_p5), %s3930_s3, 1024, %s3257_s28, [#allocation6], %s3106_s21, %s3106_s21, %s3107_s17  }
  0x45   : > { %s3932_s20 = sld [smem:[#allocation37_spill]] }
  0x4b   : > { %s2673_s16 = scalar_lea.hbm %s3932_s20, 1024 }
  0x4c   : > { %p2674_p9 = scmp.ne.s32.totalorder %s3932_s20, %s2673_s16  ;;  %p2680_p12 = scmp.lt.u32.totalorder %s2673_s16, %s3932_s20 }
  0x4e   : > { %p2676_p10 = pnand %p2674_p9, %p3283_p7 }
  0x50   : > { %p2677_p11 = pneg %p2676_p10 }
  0x52   : > { %p2682_p13 = pnand %p2680_p12, %p2677_p11 }
  0x54   : > { %2685 = shalt.err (!%p2682_p13)
}
  0x55   : > { %s2686_s28 = scalar_lea.vmem %s3271_s30, 1024  ;;  %p2694_p6 = scmp.lt.s32.totalorder %s3271_s30, %s3271_s30 }
  0x56   : > { %p2687_p0 = scmp.ne.s32.totalorder %s3271_s30, %s2686_s28  ;;  %p2695_p8 = scmp.lt.s32.totalorder %s2686_s28, %s2686_s28 }
  0x58   : > { %p2689_p2 = pnand %p2687_p0, %p3283_p7  ;;  %p2696_p9 = por %p2695_p8, %p2694_p6 }
  0x5a   : > { %p2690_p4 = pneg %p2689_p2 }
  0x5c   : > { %p2697_p10 = pnand %p2696_p9, %p2690_p4 }
  0x5e   : > { %2700 = shalt.err (!%p2697_p10)
}
  0x5f   : > { %2483 = dma.hbm_to_vmem [thread:$0]  (!%p3267_p5), %s3932_s20, 1024, %s3271_s30, [#allocation9], %s3106_s21, %s3106_s21, %s3107_s17  }
  0x60   : > { %s3933_s9 = sld [smem:[#allocation41_spill]] }
  0x66   : > { %s2701_s19 = scalar_lea.hbm %s3933_s9, 1024 }
  0x67   : > { %p2702_p11 = scmp.ne.s32.totalorder %s3933_s9, %s2701_s19  ;;  %p2708_p0 = scmp.lt.u32.totalorder %s2701_s19, %s3933_s9 }
  0x69   : > { %p2704_p12 = pnand %p2702_p11, %p3283_p7 }
  0x6b   : > { %p2705_p13 = pneg %p2704_p12 }
  0x6d   : > { %p2710_p2 = pnand %p2708_p0, %p2705_p13 }
  0x6f   : > { %2713 = shalt.err (!%p2710_p2)
}
  0x70   : > { %s2714_s30 = scalar_lea.vmem %s3273_s23, 1024  ;;  %p2722_p9 = scmp.lt.s32.totalorder %s3273_s23, %s3273_s23 }
  0x71   : > { %p2715_p4 = scmp.ne.s32.totalorder %s3273_s23, %s2714_s30  ;;  %p2723_p10 = scmp.lt.s32.totalorder %s2714_s30, %s2714_s30 }
  0x73   : > { %p2717_p6 = pnand %p2715_p4, %p3283_p7  ;;  %p2724_p11 = por %p2723_p10, %p2722_p9 }
  0x75   : > { %p2718_p8 = pneg %p2717_p6 }
  0x77   : > { %p2725_p12 = pnand %p2724_p11, %p2718_p8 }
  0x79   : > { %2728 = shalt.err (!%p2725_p12)
}
  0x7a   : > { %2489 = dma.hbm_to_vmem [thread:$0]  (!%p3267_p5), %s3933_s9, 1024, %s3273_s23, [#allocation12], %s3106_s21, %s3106_s21, %s3107_s17  }
  0x7b   : > { %s3108_s12 = smov [#allocation14]   ;;  %s3109_s18 = smov [#allocation7]  }
  0x7c   : > { %s653_s14 = sshll.u32 %s3108_s12, 4  ;;  %s573_s19 = sshll.u32 %s3109_s18, 4  ;;  %s654_s14 = int_to_ptr.vmem [resolvable:$true] %s653_s14  ;;  %s574_s19 = int_to_ptr.vmem [resolvable:$true] %s573_s19 }
  0x7d   : > { %s3934_s13 = sld [smem:[#allocation45_spill]] }
  0x83   : > { %s2729_s22 = scalar_lea.hbm %s3934_s13, 1024 }
  0x84   : > { %p2730_p13 = scmp.ne.s32.totalorder %s3934_s13, %s2729_s22  ;;  %p2736_p4 = scmp.lt.u32.totalorder %s2729_s22, %s3934_s13 }
  0x86   : > { %p2732_p0 = pnand %p2730_p13, %p3283_p7 }
  0x88   : > { %p2733_p2 = pneg %p2732_p0 }
  0x8a   : > { %p2738_p6 = pnand %p2736_p4, %p2733_p2 }
  0x8c   : > { %2741 = shalt.err (!%p2738_p6)
}
  0x8d   : > { %s2742_s23 = scalar_lea.vmem %s654_s14, 1024  ;;  %p2750_p11 = scmp.lt.s32.totalorder %s654_s14, %s654_s14 }
  0x8e   : > { %p2743_p8 = scmp.ne.s32.totalorder %s654_s14, %s2742_s23  ;;  %p2751_p12 = scmp.lt.s32.totalorder %s2742_s23, %s2742_s23 }
  0x90   : > { %p2745_p9 = pnand %p2743_p8, %p3283_p7  ;;  %p2752_p1 = por %p2751_p12, %p2750_p11 }
  0x92   : > { %p2746_p10 = pneg %p2745_p9 }
  0x94   : > { %p2753_p3 = pnand %p2752_p1, %p2746_p10 }
  0x96   : > { %2756 = shalt.err (!%p2753_p3)
}
  0x97   : > { %2495 = dma.hbm_to_vmem [thread:$0]  (!%p3267_p5), %s3934_s13, 1024, %s654_s14, [#allocation15], %s3106_s21, %s3106_s21, %s3107_s17  }
  0x98   : > { %s3935_s1 = sld [smem:[#allocation35_spill]] }
  0x9e   : > { %s2757_s24 = scalar_lea.hbm %s3935_s1, 1024 }
  0x9f   : > { %p2758_p1 = scmp.ne.s32.totalorder %s3935_s1, %s2757_s24  ;;  %p2764_p0 = scmp.lt.u32.totalorder %s2757_s24, %s3935_s1 }
  0xa1   : > { %p2760_p3 = pnand %p2758_p1, %p3283_p7 }
  0xa3   : > { %p2761_p13 = pneg %p2760_p3 }
  0xa5   : > { %p2766_p2 = pnand %p2764_p0, %p2761_p13 }
  0xa7   : > { %2769 = shalt.err (!%p2766_p2)
}
  0xa8   : > { %s2770_s23 = scalar_lea.vmem %s574_s19, 1024  ;;  %p2778_p9 = scmp.lt.s32.totalorder %s574_s19, %s574_s19 }
  0xa9   : > { %p2771_p4 = scmp.ne.s32.totalorder %s574_s19, %s2770_s23  ;;  %p2779_p10 = scmp.lt.s32.totalorder %s2770_s23, %s2770_s23 }
  0xab   : > { %p2773_p6 = pnand %p2771_p4, %p3283_p7  ;;  %p2780_p11 = por %p2779_p10, %p2778_p9 }
  0xad   : > { %p2774_p8 = pneg %p2773_p6 }
  0xaf   : > { %p2781_p12 = pnand %p2780_p11, %p2774_p8 }
  0xb1   : > { %2784 = shalt.err (!%p2781_p12)
}
  0xb2   : > { %2480 = dma.hbm_to_vmem [thread:$0]  (!%p3267_p5), %s3935_s1, 1024, %s574_s19, [#allocation6], %s3106_s21, %s3106_s21, %s3107_s17  }
  0xb3   : > { %s3110_s10 = smov [#allocation10]   ;;  %s3111_s18 = smov [#allocation13]  }
  0xb4   : > { %s605_s12 = sshll.u32 %s3110_s10, 4  ;;  %s637_s24 = sshll.u32 %s3111_s18, 4  ;;  %s606_s12 = int_to_ptr.vmem [resolvable:$true] %s605_s12  ;;  %s638_s24 = int_to_ptr.vmem [resolvable:$true] %s637_s24 }
  0xb5   : > { %s3936_s7 = sld [smem:[#allocation39_spill]] }
  0xbb   : > { %s2785_s30 = scalar_lea.hbm %s3936_s7, 1024 }
  0xbc   : > { %p2786_p1 = scmp.ne.s32.totalorder %s3936_s7, %s2785_s30  ;;  %p2792_p0 = scmp.lt.u32.totalorder %s2785_s30, %s3936_s7 }
  0xbe   : > { %p2788_p3 = pnand %p2786_p1, %p3283_p7 }
  0xc0   : > { %p2789_p13 = pneg %p2788_p3 }
  0xc2   : > { %p2794_p2 = pnand %p2792_p0, %p2789_p13 }
  0xc4   : > { %2797 = shalt.err (!%p2794_p2)
}
  0xc5   : > { %s2798_s19 = scalar_lea.vmem %s606_s12, 1024  ;;  %p2806_p9 = scmp.lt.s32.totalorder %s606_s12, %s606_s12 }
  0xc6   : > { %p2799_p4 = scmp.ne.s32.totalorder %s606_s12, %s2798_s19  ;;  %p2807_p10 = scmp.lt.s32.totalorder %s2798_s19, %s2798_s19 }
  0xc8   : > { %p2801_p6 = pnand %p2799_p4, %p3283_p7  ;;  %p2808_p11 = por %p2807_p10, %p2806_p9 }
  0xca   : > { %p2802_p8 = pneg %p2801_p6 }
  0xcc   : > { %p2809_p12 = pnand %p2808_p11, %p2802_p8 }
  0xce   : > { %2812 = shalt.err (!%p2809_p12)
}
  0xcf   : > { %2486 = dma.hbm_to_vmem [thread:$0]  (!%p3267_p5), %s3936_s7, 1024, %s606_s12, [#allocation9], %s3106_s21, %s3106_s21, %s3107_s17  }
  0xd0   : > { %s3937_s11 = sld [smem:[#allocation43_spill]] }
  0xd6   : > { %s2813_s22 = scalar_lea.hbm %s3937_s11, 1024 }
  0xd7   : > { %p2814_p1 = scmp.ne.s32.totalorder %s3937_s11, %s2813_s22  ;;  %p2820_p0 = scmp.lt.u32.totalorder %s2813_s22, %s3937_s11 }
  0xd9   : > { %p2816_p3 = pnand %p2814_p1, %p3283_p7 }
  0xdb   : > { %p2817_p13 = pneg %p2816_p3 }
  0xdd   : > { %p2822_p2 = pnand %p2820_p0, %p2817_p13 }
  0xdf   : > { %2825 = shalt.err (!%p2822_p2)
}
  0xe0   : > { %s2826_s14 = scalar_lea.vmem %s638_s24, 1024  ;;  %p2834_p9 = scmp.lt.s32.totalorder %s638_s24, %s638_s24 }
  0xe1   : > { %p2827_p4 = scmp.ne.s32.totalorder %s638_s24, %s2826_s14  ;;  %p2835_p10 = scmp.lt.s32.totalorder %s2826_s14, %s2826_s14 }
  0xe3   : > { %p2829_p6 = pnand %p2827_p4, %p3283_p7  ;;  %p2836_p11 = por %p2835_p10, %p2834_p9 }
  0xe5   : > { %p2830_p8 = pneg %p2829_p6 }
  0xe7   : > { %p2837_p12 = pnand %p2836_p11, %p2830_p8 }
  0xe9   : > { %2840 = shalt.err (!%p2837_p12)
}
  0xea   : > { %2492 = dma.hbm_to_vmem [thread:$0]  (!%p3267_p5), %s3937_s11, 1024, %s638_s24, [#allocation12], %s3106_s21, %s3106_s21, %s3107_s17  }
  0xeb   : > { %s3112_s9 = smov [#allocation16]   ;;  %s3938_s15 = sld [smem:[#allocation47_spill]] }
  0xec   : > { %s669_s3 = sshll.u32 %s3112_s9, 4  ;;  %s670_s3 = int_to_ptr.vmem [resolvable:$true] %s669_s3 }
  0xf1   : > { %s2841_s22 = scalar_lea.hbm %s3938_s15, 1024 }
  0xf2   : > { %p2842_p1 = scmp.ne.s32.totalorder %s3938_s15, %s2841_s22  ;;  %p2848_p0 = scmp.lt.u32.totalorder %s2841_s22, %s3938_s15 }
  0xf4   : > { %p2844_p3 = pnand %p2842_p1, %p3283_p7 }
  0xf6   : > { %p2845_p13 = pneg %p2844_p3 }
  0xf8   : > { %p2850_p2 = pnand %p2848_p0, %p2845_p13 }
  0xfa   : > { %2853 = shalt.err (!%p2850_p2)
}
  0xfb   : > { %s2854_s24 = scalar_lea.vmem %s670_s3, 1024  ;;  %p2862_p9 = scmp.lt.s32.totalorder %s670_s3, %s670_s3 }
  0xfc   : > { %p2855_p4 = scmp.ne.s32.totalorder %s670_s3, %s2854_s24  ;;  %p2863_p10 = scmp.lt.s32.totalorder %s2854_s24, %s2854_s24 }
  0xfe   : > { %p2857_p6 = pnand %p2855_p4, %p3283_p7  ;;  %p2864_p11 = por %p2863_p10, %p2862_p9 }
 0x100   : > { %p2858_p8 = pneg %p2857_p6 }
 0x102   : > { %p2865_p12 = pnand %p2864_p11, %p2858_p8 }
 0x104   : > { %2868 = shalt.err (!%p2865_p12)
}
 0x105   : > { %2498 = dma.hbm_to_vmem [thread:$0]  (!%p3267_p5), %s3938_s15, 1024, %s670_s3, [#allocation15], %s3106_s21, %s3106_s21, %s3107_s17  }
 0x106   : > { %s3898_s5 = sadd.s32 4294967294, %s3101_s27   ;;  %s3466_s4 = sadd.s32 1, %s3101_s27  }
 0x107   : > { %s52_s19 = ssub.s32 %s3101_s27, %s3466_s4  ;;  %s55_s9 = sadd.s32 1, %s3097_s26 }
 0x108   : > { %p53_p7 = scmp.eq.s32.totalorder %s52_s19, 0  ;;  %p62_p1 = scmp.ne.s32.totalorder %s3097_s26, %s3093_s25 }
 0x109   : > { %p63_p3 = scmp.eq.s32.totalorder %s3101_s27, 0  ;;  %p68_p13 = scmp.ne.s32.totalorder %s3093_s25, %s3089_s2 }
 0x10a   : > { %s3477_s10 = scalar_select %p53_p7, %s3097_s26, %s55_s9  }
 0x10b   : > { %p3479_p0 = por %p63_p3, %p62_p1  ;;  %p3940_p2 = scmp.eq.s32.totalorder %s3252_s29, 0 }
 0x10c   : > { %p428_p4 = scmp.eq.s32.totalorder %s3252_s29, 2  ;;  %p434_p6 = scmp.eq.s32.totalorder %s3898_s5, 2 }
 0x10d   : > { %p3485_p5 = por %p3940_p2, %p68_p13  ;;  %p2527_p8 = scmp.lt.s32.totalorder %s3101_s27, 3 }
 0x10e   : > { %s686_s17 = sand.u32 1, %s3097_s26   ;;  %p3494_p9 = por %p428_p4, %p62_p1 }
 0x10f   : > { %p3498_p10 = por %p434_p6, %p68_p13  ;;  %s2097_s16 = sshll.u32 %s686_s17, 3 }
 0x110   : > { %s3942_s3 = scalar_select %p3494_p9, 1, 0 }
 0x111   : > { %s3943_s22 = scalar_select %p3498_p10, 1, 0 }
 0x112   : > { %s2098_s30 = sshll.u32 %s3101_s27, 7  ;;  %s3944_s24 = sld [smem:[#allocation32_spill]] }
 0x113   : > { %s690_s12 = scalar_lea.vmem [#allocation2], %s2097_s16  ;;  %p3512_p11 = pnand %p2527_p8, %p3479_p0 }
 0x114   : > { %s697_s19 = sshll.u32 %s690_s12, 4  ;;  %s687_s5 = scalar_lea.sflag [#allocation3], %s686_s17  ;;  %s3508_s19 = int_to_ptr.vmem [resolvable:$true] %s697_s19 }
 0x115   : > { %p2871_p7 = pneg %p3512_p11 }
 0x118   : > { %s3506_s14 = scalar_lea.hbm %s3944_s24, %s2098_s30  ;;  %s2874_s28 = scalar_lea.hbm %s3944_s24, 384 }
 0x119   : > { %s2869_s1 = scalar_lea.hbm %s3506_s14, 128  ;;  %p2875_p13 = scmp.lt.u32.totalorder %s3506_s14, %s3944_s24 }
 0x11a   : > { %p2870_p12 = scmp.ne.s32.totalorder %s3506_s14, %s2869_s1  ;;  %p2876_p0 = scmp.lt.u32.totalorder %s2874_s28, %s2869_s1 }
 0x11b   : > { %p2878_p4 = scmp.lt.u32.totalorder %s2869_s1, %s3506_s14 }
 0x11c   : > { %p2872_p1 = pnand %p2871_p7, %p2870_p12  ;;  %p2877_p2 = por %p2876_p0, %p2875_p13 }
 0x11e   : > { %p2873_p3 = pneg %p2872_p1  ;;  %p2879_p6 = por %p2878_p4, %p2877_p2 }
 0x120   : > { %p2880_p8 = pnand %p2879_p6, %p2873_p3 }
 0x122   : > { %2883 = shalt.err (!%p2880_p8)
}
 0x123   : > { %s2884_s17 = scalar_lea.vmem %s3508_s19, 128  ;;  %s3113_s12 = smov [#allocation2]  }
 0x124   : > { %p2885_p12 = scmp.ne.s32.totalorder %s3508_s19, %s2884_s17  ;;  %s2889_s16 = sshll.u32 %s3113_s12, 4  ;;  %s2890_s16 = int_to_ptr.vmem [resolvable:$false] %s2889_s16 }
 0x125   : > { %s2891_s30 = scalar_lea.vmem %s2890_s16, 256  ;;  %p2892_p9 = scmp.lt.s32.totalorder %s3508_s19, %s2890_s16 }
 0x126   : > { %p2887_p1 = pnand %p2885_p12, %p2871_p7  ;;  %p2893_p13 = scmp.lt.s32.totalorder %s2891_s30, %s2884_s17 }
 0x128   : > { %p2888_p10 = pneg %p2887_p1  ;;  %p2894_p0 = por %p2893_p13, %p2892_p9 }
 0x12a   : > { %p2895_p2 = pnand %p2894_p0, %p2888_p10 }
 0x12c   : > { %2898 = shalt.err (!%p2895_p2)
}
 0x12d   : > { %2502 = dma.hbm_to_vmem [thread:$0]  (!%p3512_p11), %s3506_s14, 128, %s3508_s19, %s687_s5  }
 0x12e   : > { %p3946_p3 = scmp.ne.s32.totalorder %s3928_s0, 0 }
 0x12f   : > { %s3544_s1 = sand.u32 (!%p3946_p3), 1, %s3093_s25  }
 0x130   : > { %706 = sbr.rel (%p3946_p3) target bundleno = 2111 (0x83f), region = 88  ;;  %s3547_s28 = sshll.u32 (!%p3946_p3), %s3544_s1, 3 }
 0x131   : > { %s709_s18 = scalar_lea.sflag (!%p3946_p3), [#allocation3], %s3544_s1  ;;  %s712_s23 = scalar_lea.vmem (!%p3946_p3), [#allocation2], %s3547_s28 }
 0x137   : > { %3056 = dma.done.wait (%p3485_p5), %s709_s18, 128  }
 0x138   : > { %3058 = vsyncadd (%p3485_p5), %s709_s18, 4294967168  ;;  %p3947_p9 = scmp.eq.s32.totalorder %s3252_s29, 0 }
 0x13a   : > { %3060 = dma.done.wait (%p3947_p9), [#allocation6], 2048   ;;  %p3948_p10 = pmov %p3947_p9 }
 0x13b   : > { %p3949_p11 = pmov %p3947_p9 }
 0x13c   : > { %3062 = vsyncadd (%p3948_p10), [#allocation6], 4294965248 }
 0x13d   : > { %3064 = dma.done.wait (%p3949_p11), [#allocation9], 2048   ;;  %p3950_p7 = pmov %p3947_p9 }
 0x13f   : > { %3066 = vsyncadd (%p3950_p7), [#allocation9], 4294965248  ;;  %p3951_p4 = pmov %p3950_p7 }
 0x141   : > { %3068 = dma.done.wait (%p3951_p4), [#allocation12], 2048   ;;  %p3952_p6 = pmov %p3951_p4 }
 0x142   : > { %p3953_p5 = pmov %p3951_p4 }
 0x143   : > { %3070 = vsyncadd (%p3952_p6), [#allocation12], 4294965248 }
 0x144   : > { %3072 = dma.done.wait (%p3953_p5), [#allocation15], 2048   ;;  %p3954_p8 = pmov %p3951_p4 }
 0x145   : > { %v3114_v0 = vmov 0.0   ;;  %vm3115_vm0 = vmmov 0   ;;  %v2581_v1 = vld [vmem:[#allocation5] sm:$0xff]   ;;  %v2582_v2 = vld [vmem:[#allocation5 + $0x8] sm:$0xff]   ;;  %v2583_v3 = vld [vmem:[#allocation5 + $0x10] sm:$0xff]   ;;  %s3955_s21 = sld [smem:[#allocation34_spill]] }
 0x146   : > { %3074 = vsyncadd (%p3954_p8), [#allocation15], 4294965248  ;;  %2270 = vmatprep.subr.bf16.mxu0 %v3114_v0  ;;  %2286 = vmatprep.mubr.msk.bf16.mxu0 %vm3115_vm0, %v3114_v0  ;;  %v2589_v4 = vld [vmem:[#allocation7] sm:$0xff]   ;;  %v2584_v5 = vld [vmem:[#allocation5 + $0x18] sm:$0xff]   ;;  %s801_s14 = scalar_lea.vmem [#allocation18], %s3547_s28  ;;  %s3956_s17 = sld [smem:[#allocation36_spill]] }
 0x147   : > { %2290 = vmatprep.subr.bf16.mxu1 %v3114_v0  ;;  %2306 = vmatprep.mubr.msk.bf16.mxu1 %vm3115_vm0, %v3114_v0  ;;  %v2590_v6 = vld [vmem:[#allocation7 + $0x8] sm:$0xff]   ;;  %v2585_v7 = vld [vmem:[#allocation5 + $0x20] sm:$0xff]   ;;  %v2591_v8 = vld [vmem:[#allocation7 + $0x10] sm:$0xff]   ;;  %s3901_s12 = scalar_lea.vmem [#allocation20], %s3547_s28  ;;  %s3957_s6 = sld [smem:[#allocation38_spill]] }
 0x148   : > { %2271 = vmatpush3.bf16.msra.mxu0 %v2581_v1  ;;  %2291 = vmatpush3.bf16.msra.mxu1 %v2589_v4  ;;  %v2586_v9 = vld [vmem:[#allocation5 + $0x28] sm:$0xff]   ;;  %v2592_v10 = vld [vmem:[#allocation7 + $0x18] sm:$0xff]   ;;  %v2587_v11 = vld [vmem:[#allocation5 + $0x30] sm:$0xff]   ;;  %s3903_s18 = scalar_lea.vmem [#allocation21], %s3547_s28  ;;  %s3958_s8 = sld [smem:[#allocation40_spill]] }
 0x149   : > { %2272 = vmatprep.subr.bf16.mxu0 %v3114_v0  ;;  %2292 = vmatprep.subr.bf16.mxu1 %v3114_v0  ;;  %v2593_v12 = vld [vmem:[#allocation7 + $0x20] sm:$0xff]   ;;  %v2588_v13 = vld [vmem:[#allocation5 + $0x38] sm:$0xff]   ;;  %v2594_v15 = vld [vmem:[#allocation7 + $0x28] sm:$0xff]   ;;  %s3902_s5 = scalar_lea.vmem [#allocation23], %s3547_s28  ;;  %s3959_s9 = sld [smem:[#allocation42_spill]] }
 0x14a   : > { %v824_v14 = vld [vmem:[%s712_s23] sm:$0xff]  ;;  %v2597_v19 = vld [vmem:[#allocation8] sm:$0xff]   ;;  %v2598_v20 = vld [vmem:[#allocation8 + $0x8] sm:$0xff]   ;;  %s3960_s30 = sld [smem:[#allocation44_spill]]  ;;  %s3904_s19 = sand.u32 1, %s3252_s29  }
 0x14b   : > { %v825_v16 = vpack.c.bf16 %v824_v14, %v824_v14  ;;  %v2595_v17 = vld [vmem:[#allocation7 + $0x30] sm:$0xff]   ;;  %v2596_v18 = vld [vmem:[#allocation7 + $0x38] sm:$0xff]   ;;  %v2601_v23 = vld [vmem:[#allocation8 + $0x20] sm:$0xff]   ;;  %s1779_s0 = sshll.u32 %s801_s14, 4  ;;  %p3964_p1 = scmp.ne.s32.totalorder %s3942_s3, 0  ;;  %s3698_s0 = int_to_ptr.vmem [resolvable:$true] %s1779_s0 }
 0x14c   : > { %2273 = vmatpush3.bf16.msra.mxu0 %v2582_v2  ;;  %2293 = vmatpush3.bf16.msra.mxu1 %v2590_v6  ;;  %v2599_v21 = vld [vmem:[#allocation8 + $0x10] sm:$0xff]   ;;  %v2600_v22 = vld [vmem:[#allocation8 + $0x18] sm:$0xff]   ;;  %v2602_v24 = vld [vmem:[#allocation8 + $0x28] sm:$0xff]   ;;  %s2899_s7 = scalar_lea.vmem %s3698_s0, 128 }
 0x14d   : > { %2274 = vmatprep.subr.bf16.mxu0 %v3114_v0  ;;  %2294 = vmatprep.subr.bf16.mxu1 %v3114_v0  ;;  %v2114_v25 = vld [vmem:[%s3955_s21] ss:$0 sm:$0xff]  ;;  %v2604_v34 = vld [vmem:[#allocation8 + $0x38] sm:$0xff]   ;;  %v2605_v35 = vld [vmem:[#allocation10] sm:$0xff]   ;;  %s3961_s21 = sld [smem:[#allocation46_spill]]  ;;  %p2900_p12 = scmp.ne.s32.totalorder %s3698_s0, %s2899_s7 }
 0x14e   : > { %v2603_v33 = vld [vmem:[#allocation8 + $0x30] sm:$0xff]   ;;  %v2606_v36 = vld [vmem:[#allocation10 + $0x8] sm:$0xff]   ;;  %v2608_v38 = vld [vmem:[#allocation10 + $0x18] sm:$0xff]  }
 0x14f   : > { %v2607_v37 = vld [vmem:[#allocation10 + $0x10] sm:$0xff]   ;;  %v2609_v39 = vld [vmem:[#allocation10 + $0x20] sm:$0xff]   ;;  %v2610_v40 = vld [vmem:[#allocation10 + $0x28] sm:$0xff]   ;;  %p2901_p13 = pnand %p2900_p12, %p3964_p1 }
 0x150   : > { %2275 = vmatpush3.bf16.msra.mxu0 %v2583_v3  ;;  %2295 = vmatpush3.bf16.msra.mxu1 %v2591_v8  ;;  %v2123_v41 = vld [vmem:[%s3956_s17] ss:$0 sm:$0xff]  ;;  %v2612_v50 = vld [vmem:[#allocation10 + $0x38] sm:$0xff]   ;;  %v2613_v51 = vld [vmem:[#allocation11] sm:$0xff]   ;;  %s3116_s17 = smov [#allocation18]  }
 0x151   : > { %2276 = vmatprep.subr.bf16.mxu0 %v3114_v0  ;;  %2296 = vmatprep.subr.bf16.mxu1 %v3114_v0  ;;  %v2611_v49 = vld [vmem:[#allocation10 + $0x30] sm:$0xff]   ;;  %v2614_v52 = vld [vmem:[#allocation11 + $0x8] sm:$0xff]   ;;  %v2616_v54 = vld [vmem:[#allocation11 + $0x18] sm:$0xff]   ;;  %p2902_p0 = pneg %p2901_p13 }
 0x152   : > { %v2615_v53 = vld [vmem:[#allocation11 + $0x10] sm:$0xff]   ;;  %v2617_v55 = vld [vmem:[#allocation11 + $0x20] sm:$0xff]   ;;  %v2618_v56 = vld [vmem:[#allocation11 + $0x28] sm:$0xff]  }
 0x153   : > { %v2619_v57 = vld [vmem:[#allocation11 + $0x30] sm:$0xff]   ;;  %v2620_v3 = vld [vmem:[#allocation11 + $0x38] sm:$0xff]   ;;  %v2621_v4 = vld [vmem:[#allocation13] sm:$0xff]  }
 0x154   : > { %2277 = vmatpush3.bf16.msra.mxu0 %v2584_v5  ;;  %2297 = vmatpush3.bf16.msra.mxu1 %v2592_v10  ;;  %v2132_v58 = vld [vmem:[%s3957_s6] ss:$0 sm:$0xff]  ;;  %v2622_v5 = vld [vmem:[#allocation13 + $0x8] sm:$0xff]   ;;  %v2625_v8 = vld [vmem:[#allocation13 + $0x20] sm:$0xff]   ;;  %s3708_s6 = scalar_lea.sflag [#allocation19], %s3904_s19 }
 0x155   : > { %2278 = vmatprep.subr.bf16.mxu0 %v3114_v0  ;;  %2298 = vmatprep.subr.bf16.mxu1 %v3114_v0  ;;  %v2623_v6 = vld [vmem:[#allocation13 + $0x10] sm:$0xff]  }
 0x156   : > { %v2141_v10 = vld [vmem:[%s3958_s8] ss:$0 sm:$0xff] }
 0x158   : > { %2279 = vmatpush3.bf16.msra.mxu0 %v2585_v7  ;;  %2299 = vmatpush3.bf16.msra.mxu1 %v2593_v12  ;;  %v2624_v7 = vld [vmem:[#allocation13 + $0x18] sm:$0xff]  }
 0x159   : > { %2280 = vmatprep.subr.bf16.mxu0 %v3114_v0  ;;  %2300 = vmatprep.subr.bf16.mxu1 %v3114_v0 }
 0x15c   : > { %2281 = vmatpush3.bf16.msra.mxu0 %v2586_v9  ;;  %2301 = vmatpush3.bf16.msra.mxu1 %v2594_v15  ;;  %v2626_v9 = vld [vmem:[#allocation13 + $0x28] sm:$0xff]  }
 0x15d   : > { %2282 = vmatprep.subr.bf16.mxu0 %v3114_v0  ;;  %2302 = vmatprep.subr.bf16.mxu1 %v3114_v0 }
 0x160   : > { %2283 = vmatpush3.bf16.msra.mxu0 %v2587_v11  ;;  %2303 = vmatpush3.bf16.msra.mxu1 %v2595_v17  ;;  %v2627_v17 = vld [vmem:[#allocation13 + $0x30] sm:$0xff]  }
 0x161   : > { %2284 = vmatprep.subr.bf16.mxu0 %v3114_v0  ;;  %2304 = vmatprep.subr.bf16.mxu1 %v3114_v0 }
 0x164   : > { %2285 = vmatpush3.bf16.msra.mxu0 %v2588_v13  ;;  %2305 = vmatpush3.bf16.msra.mxu1 %v2596_v18  ;;  %v2628_v18 = vld [vmem:[#allocation13 + $0x38] sm:$0xff]  }
 0x165   : > { %2310 = vmatprep.subr.bf16.mxu0 %v3114_v0  ;;  %2330 = vmatprep.subr.bf16.mxu1 %v3114_v0 }
 0x167   : > { %2287 = vmatmul.mubr.bf16.vlgmr.msra.gmra.mrb[0].mxu0 %v825_v16 }
 0x168   : > { %2326 = vmatprep.mubr.msk.bf16.mxu0 %vm3115_vm0, %v3114_v0  ;;  %2311 = vmatpush3.bf16.msra.mxu0 %v2597_v19  ;;  %v2629_v19 = vld [vmem:[#allocation14] sm:$0xff]  }
 0x169   : > { %2312 = vmatprep.subr.bf16.mxu0 %v3114_v0 }
 0x16c   : > { %2313 = vmatpush3.bf16.msra.mxu0 %v2598_v20  ;;  %v2630_v20 = vld [vmem:[#allocation14 + $0x8] sm:$0xff]  }
 0x16d   : > { %2314 = vmatprep.subr.bf16.mxu0 %v3114_v0 }
 0x170   : > { %2315 = vmatpush3.bf16.msra.mxu0 %v2599_v21  ;;  %v2631_v21 = vld [vmem:[#allocation14 + $0x10] sm:$0xff]  }
 0x171   : > { %2316 = vmatprep.subr.bf16.mxu0 %v3114_v0 }
 0x174   : > { %2317 = vmatpush3.bf16.msra.mxu0 %v2600_v22  ;;  %v2632_v22 = vld [vmem:[#allocation14 + $0x18] sm:$0xff]  }
 0x175   : > { %2318 = vmatprep.subr.bf16.mxu0 %v3114_v0 }
 0x178   : > { %2319 = vmatpush3.bf16.msra.mxu0 %v2601_v23  ;;  %v2633_v23 = vld [vmem:[#allocation14 + $0x20] sm:$0xff]  }
 0x179   : > { %2320 = vmatprep.subr.bf16.mxu0 %v3114_v0 }
 0x17c   : > { %2321 = vmatpush3.bf16.msra.mxu0 %v2602_v24  ;;  %v2634_v24 = vld [vmem:[#allocation14 + $0x28] sm:$0xff]  }
 0x17d   : > { %2322 = vmatprep.subr.bf16.mxu0 %v3114_v0 }
 0x180   : > { %2323 = vmatpush3.bf16.msra.mxu0 %v2603_v33  ;;  %v2635_v33 = vld [vmem:[#allocation14 + $0x30] sm:$0xff]  }
 0x181   : > { %2324 = vmatprep.subr.bf16.mxu0 %v3114_v0 }
 0x184   : > { %2325 = vmatpush3.bf16.msra.mxu0 %v2604_v34  ;;  %v2636_v34 = vld [vmem:[#allocation14 + $0x38] sm:$0xff]  }
 0x185   : > { %2350 = vmatprep.subr.bf16.mxu0 %v3114_v0 }
 0x23a   : > { %v931_v26 = vpop.f32.mrb[0].mxu0 }
 0x23b   : > { %v932_v27 = vadd.f32 %v2114_v25, %v931_v26  ;;  %v2288_v28 = vpop.f32.mrb[1].mxu0  ;;  %v2150_v25 = vld [vmem:[%s3959_s9] ss:$0 sm:$0xff]  ;;  %s3688_s9 = sshll.u32 %s3252_s29, 7 }
 0x23c   : > { %v934_v29 = vpop.f32.mrb[2].mxu0 }
 0x23d   : > { %v937_v30 = vmax.f32 %v932_v27, 0.0  ;;  %v2289_v31 = vpop.f32.mrb[3].mxu0 }
 0x23f   : > { %938 = vst [vmem:[%s801_s14] sm:$0xff] %v937_v30  ;;  %v939_v32 = vpack.c.bf16 %v937_v30, %v937_v30  ;;  %s2903_s14 = sshll.u32 %s3116_s17, 4  ;;  %s2904_s14 = int_to_ptr.vmem [resolvable:$false] %s2903_s14 }
 0x240   : > { %s2905_s16 = scalar_lea.vmem %s2904_s14, 256  ;;  %p2906_p2 = scmp.lt.s32.totalorder %s3698_s0, %s2904_s14 }
 0x241   : > { %2307 = vmatmul.mubr.bf16.vlgmr.msra.gmra.mrb[0].mxu1 %v939_v32  ;;  %p2907_p3 = scmp.lt.s32.totalorder %s2905_s16, %s2899_s7 }
 0x242   : > { %2346 = vmatprep.mubr.msk.bf16.mxu1 %vm3115_vm0, %v3114_v0  ;;  %2331 = vmatpush3.bf16.msra.mxu1 %v2605_v35  ;;  %v2637_v35 = vld [vmem:[#allocation16] sm:$0xff]  }
 0x243   : > { %2332 = vmatprep.subr.bf16.mxu1 %v3114_v0  ;;  %p2908_p9 = por %p2907_p3, %p2906_p2 }
 0x245   : > { %p2909_p10 = pnand %p2908_p9, %p2902_p0 }
 0x246   : > { %2333 = vmatpush3.bf16.msra.mxu1 %v2606_v36  ;;  %v2638_v36 = vld [vmem:[#allocation16 + $0x8] sm:$0xff]  }
 0x247   : > { %2334 = vmatprep.subr.bf16.mxu1 %v3114_v0 }
 0x24a   : > { %2335 = vmatpush3.bf16.msra.mxu1 %v2607_v37  ;;  %v2639_v37 = vld [vmem:[#allocation16 + $0x10] sm:$0xff]  }
 0x24b   : > { %2336 = vmatprep.subr.bf16.mxu1 %v3114_v0 }
 0x24e   : > { %2337 = vmatpush3.bf16.msra.mxu1 %v2608_v38  ;;  %v2640_v38 = vld [vmem:[#allocation16 + $0x18] sm:$0xff]  }
 0x24f   : > { %2338 = vmatprep.subr.bf16.mxu1 %v3114_v0 }
 0x252   : > { %2339 = vmatpush3.bf16.msra.mxu1 %v2609_v39  ;;  %v2641_v39 = vld [vmem:[#allocation16 + $0x20] sm:$0xff]  }
 0x253   : > { %2340 = vmatprep.subr.bf16.mxu1 %v3114_v0 }
 0x256   : > { %2341 = vmatpush3.bf16.msra.mxu1 %v2610_v40  ;;  %v2642_v40 = vld [vmem:[#allocation16 + $0x28] sm:$0xff]  }
 0x257   : > { %2342 = vmatprep.subr.bf16.mxu1 %v3114_v0 }
 0x25a   : > { %2343 = vmatpush3.bf16.msra.mxu1 %v2611_v49  ;;  %v2643_v49 = vld [vmem:[#allocation16 + $0x30] sm:$0xff]  }
 0x25b   : > { %2344 = vmatprep.subr.bf16.mxu1 %v3114_v0 }
 0x25e   : > { %2345 = vmatpush3.bf16.msra.mxu1 %v2612_v50  ;;  %v2644_v50 = vld [vmem:[#allocation16 + $0x38] sm:$0xff]  }
 0x25f   : > { %2370 = vmatprep.subr.bf16.mxu1 %v3114_v0 }
 0x314   : > { %v1045_v42 = vpop.f32.mrb[0].mxu1 }
 0x315   : > { %v1046_v43 = vadd.f32 %v2123_v41, %v1045_v42  ;;  %v2308_v44 = vpop.f32.mrb[1].mxu1  ;;  %v2159_v41 = vld [vmem:[%s3960_s30] ss:$0 sm:$0xff]  ;;  %s3962_s30 = sld [smem:[#allocation50_spill]] }
 0x316   : > { %v1048_v45 = vpop.f32.mrb[2].mxu1 }
 0x317   : > { %v1051_v46 = vmax.f32 %v1046_v43, 0.0  ;;  %v2309_v47 = vpop.f32.mrb[3].mxu1 }
 0x319   : > { %1052 = vst [vmem:[%s3901_s12] sm:$0xff] %v1051_v46  ;;  %v1053_v48 = vpack.c.bf16 %v1051_v46, %v1051_v46 }
 0x31b   : > { %2327 = vmatmul.mubr.bf16.vlgmr.msra.gmra.mrb[4].mxu0 %v1053_v48  ;;  %s3694_s23 = scalar_lea.hbm %s3962_s30, %s3688_s9 }
 0x31c   : > { %2366 = vmatprep.mubr.msk.bf16.mxu0 %vm3115_vm0, %v3114_v0  ;;  %2351 = vmatpush3.bf16.msra.mxu0 %v2613_v51  ;;  %v2168_v51 = vld [vmem:[%s3961_s21] ss:$0 sm:$0xff] }
 0x31d   : > { %2352 = vmatprep.subr.bf16.mxu0 %v3114_v0 }
 0x320   : > { %2353 = vmatpush3.bf16.msra.mxu0 %v2614_v52 }
 0x321   : > { %2354 = vmatprep.subr.bf16.mxu0 %v3114_v0 }
 0x324   : > { %2355 = vmatpush3.bf16.msra.mxu0 %v2615_v53 }
 0x325   : > { %2356 = vmatprep.subr.bf16.mxu0 %v3114_v0 }
 0x328   : > { %2357 = vmatpush3.bf16.msra.mxu0 %v2616_v54 }
 0x329   : > { %2358 = vmatprep.subr.bf16.mxu0 %v3114_v0 }
 0x32c   : > { %2359 = vmatpush3.bf16.msra.mxu0 %v2617_v55 }
 0x32d   : > { %2360 = vmatprep.subr.bf16.mxu0 %v3114_v0 }
 0x330   : > { %2361 = vmatpush3.bf16.msra.mxu0 %v2618_v56 }
 0x331   : > { %2362 = vmatprep.subr.bf16.mxu0 %v3114_v0 }
 0x334   : > { %2363 = vmatpush3.bf16.msra.mxu0 %v2619_v57 }
 0x335   : > { %2364 = vmatprep.subr.bf16.mxu0 %v3114_v0 }
 0x338   : > { %2365 = vmatpush3.bf16.msra.mxu0 %v2620_v3 }
 0x339   : > { %2390 = vmatprep.subr.bf16.mxu0 %v3114_v0 }
 0x3ee   : > { %v1159_v59 = vpop.f32.mrb[4].mxu0 }
 0x3ef   : > { %v1160_v60 = vadd.f32 %v2132_v58, %v1159_v59  ;;  %v2328_v61 = vpop.f32.mrb[5].mxu0 }
 0x3f0   : > { %v1162_v62 = vpop.f32.mrb[6].mxu0 }
 0x3f1   : > { %v1165_v63 = vmax.f32 %v1160_v60, 0.0  ;;  %v2329_v1 = vpop.f32.mrb[7].mxu0 }
 0x3f3   : > { %1166 = vst [vmem:[%s3903_s18] sm:$0xff] %v1165_v63  ;;  %v1167_v2 = vpack.c.bf16 %v1165_v63, %v1165_v63 }
 0x3f5   : > { %2347 = vmatmul.mubr.bf16.vlgmr.msra.gmra.mrb[4].mxu1 %v1167_v2 }
 0x3f6   : > { %2386 = vmatprep.mubr.msk.bf16.mxu1 %vm3115_vm0, %v3114_v0  ;;  %2371 = vmatpush3.bf16.msra.mxu1 %v2621_v4 }
 0x3f7   : > { %2372 = vmatprep.subr.bf16.mxu1 %v3114_v0 }
 0x3fa   : > { %2373 = vmatpush3.bf16.msra.mxu1 %v2622_v5 }
 0x3fb   : > { %2374 = vmatprep.subr.bf16.mxu1 %v3114_v0 }
 0x3fe   : > { %2375 = vmatpush3.bf16.msra.mxu1 %v2623_v6 }
 0x3ff   : > { %2376 = vmatprep.subr.bf16.mxu1 %v3114_v0 }
 0x402   : > { %2377 = vmatpush3.bf16.msra.mxu1 %v2624_v7 }
 0x403   : > { %2378 = vmatprep.subr.bf16.mxu1 %v3114_v0 }
 0x406   : > { %2379 = vmatpush3.bf16.msra.mxu1 %v2625_v8 }
 0x407   : > { %2380 = vmatprep.subr.bf16.mxu1 %v3114_v0 }
 0x40a   : > { %2381 = vmatpush3.bf16.msra.mxu1 %v2626_v9 }
 0x40b   : > { %2382 = vmatprep.subr.bf16.mxu1 %v3114_v0 }
 0x40e   : > { %2383 = vmatpush3.bf16.msra.mxu1 %v2627_v17 }
 0x40f   : > { %2384 = vmatprep.subr.bf16.mxu1 %v3114_v0 }
 0x412   : > { %2385 = vmatpush3.bf16.msra.mxu1 %v2628_v18 }
 0x413   : > { %2410 = vmatprep.subr.bf16.mxu1 %v3114_v0 }
 0x4c8   : > { %v1273_v11 = vpop.f32.mrb[4].mxu1 }
 0x4c9   : > { %v1274_v12 = vadd.f32 %v2141_v10, %v1273_v11  ;;  %v2348_v13 = vpop.f32.mrb[5].mxu1 }
 0x4ca   : > { %v1276_v14 = vpop.f32.mrb[6].mxu1 }
 0x4cb   : > { %1279 = vst [vmem:[%s3902_s5] sm:$0xff] %v1274_v12  ;;  %v1280_v15 = vpack.c.bf16 %v1274_v12, %v1274_v12  ;;  %v2349_v16 = vpop.f32.mrb[7].mxu1  ;;  %s3963_s5 = sld [smem:[#allocation52_spill]] }
 0x4cd   : > { %2367 = vmatmul.mubr.bf16.vlgmr.msra.gmra.mrb[8].mxu0 %v1280_v15 }
 0x4ce   : > { %2406 = vmatprep.mubr.msk.bf16.mxu0 %vm3115_vm0, %v3114_v0  ;;  %2391 = vmatpush3.bf16.msra.mxu0 %v2629_v19 }
 0x4cf   : > { %2392 = vmatprep.subr.bf16.mxu0 %v3114_v0 }
 0x4d1   : > { %s3704_s18 = scalar_lea.hbm %s3963_s5, %s3688_s9 }
 0x4d2   : > { %2393 = vmatpush3.bf16.msra.mxu0 %v2630_v20 }
 0x4d3   : > { %2394 = vmatprep.subr.bf16.mxu0 %v3114_v0 }
 0x4d6   : > { %2395 = vmatpush3.bf16.msra.mxu0 %v2631_v21 }
 0x4d7   : > { %2396 = vmatprep.subr.bf16.mxu0 %v3114_v0 }
 0x4da   : > { %2397 = vmatpush3.bf16.msra.mxu0 %v2632_v22 }
 0x4db   : > { %2398 = vmatprep.subr.bf16.mxu0 %v3114_v0 }
 0x4de   : > { %2399 = vmatpush3.bf16.msra.mxu0 %v2633_v23 }
 0x4df   : > { %2400 = vmatprep.subr.bf16.mxu0 %v3114_v0 }
 0x4e2   : > { %2401 = vmatpush3.bf16.msra.mxu0 %v2634_v24 }
 0x4e3   : > { %2402 = vmatprep.subr.bf16.mxu0 %v3114_v0 }
 0x4e6   : > { %2403 = vmatpush3.bf16.msra.mxu0 %v2635_v33 }
 0x4e7   : > { %2404 = vmatprep.subr.bf16.mxu0 %v3114_v0 }
 0x4ea   : > { %2405 = vmatpush3.bf16.msra.mxu0 %v2636_v34 }
 0x5a0   : > { %v1386_v26 = vpop.f32.mrb[8].mxu0 }
 0x5a1   : > { %v1387_v27 = vadd.f32 %v2150_v25, %v1386_v26  ;;  %v2368_v28 = vpop.f32.mrb[9].mxu0 }
 0x5a2   : > { %v1389_v29 = vpop.f32.mrb[10].mxu0 }
 0x5a3   : > { %v1392_v30 = vmax.f32 %v1387_v27, 0.0  ;;  %v2369_v31 = vpop.f32.mrb[11].mxu0 }
 0x5a5   : > { %v1393_v32 = vpack.c.bf16 %v1392_v30, %v1392_v30 }
 0x5a7   : > { %2387 = vmatmul.mubr.bf16.vlgmr.msra.gmra.mrb[8].mxu1 %v1393_v32 }
 0x5a8   : > { %2426 = vmatprep.mubr.msk.bf16.mxu1 %vm3115_vm0, %v3114_v0  ;;  %2411 = vmatpush3.bf16.msra.mxu1 %v2637_v35 }
 0x5a9   : > { %2412 = vmatprep.subr.bf16.mxu1 %v3114_v0 }
 0x5ac   : > { %2413 = vmatpush3.bf16.msra.mxu1 %v2638_v36 }
 0x5ad   : > { %2414 = vmatprep.subr.bf16.mxu1 %v3114_v0 }
 0x5b0   : > { %2415 = vmatpush3.bf16.msra.mxu1 %v2639_v37 }
 0x5b1   : > { %2416 = vmatprep.subr.bf16.mxu1 %v3114_v0 }
 0x5b4   : > { %2417 = vmatpush3.bf16.msra.mxu1 %v2640_v38 }
 0x5b5   : > { %2418 = vmatprep.subr.bf16.mxu1 %v3114_v0 }
 0x5b8   : > { %2419 = vmatpush3.bf16.msra.mxu1 %v2641_v39 }
 0x5b9   : > { %2420 = vmatprep.subr.bf16.mxu1 %v3114_v0 }
 0x5bc   : > { %2421 = vmatpush3.bf16.msra.mxu1 %v2642_v40 }
 0x5bd   : > { %2422 = vmatprep.subr.bf16.mxu1 %v3114_v0 }
 0x5c0   : > { %2423 = vmatpush3.bf16.msra.mxu1 %v2643_v49 }
 0x5c1   : > { %2424 = vmatprep.subr.bf16.mxu1 %v3114_v0 }
 0x5c4   : > { %2425 = vmatpush3.bf16.msra.mxu1 %v2644_v50 }
 0x67a   : > { %v1499_v42 = vpop.f32.mrb[8].mxu1 }
 0x67b   : > { %v1500_v43 = vadd.f32 %v2159_v41, %v1499_v42  ;;  %v2388_v44 = vpop.f32.mrb[9].mxu1 }
 0x67c   : > { %v1502_v45 = vpop.f32.mrb[10].mxu1 }
 0x67d   : > { %v1505_v46 = vmax.f32 %v1500_v43, 0.0  ;;  %v2389_v47 = vpop.f32.mrb[11].mxu1 }
 0x67f   : > { %v1506_v48 = vpack.c.bf16 %v1505_v46, %v1505_v46 }
 0x681   : > { %2407 = vmatmul.mubr.bf16.vlgmr.msra.gmra.mrb[12].mxu0 %v1506_v48 }
 0x754   : > { %v1612_v52 = vpop.f32.mrb[12].mxu0 }
 0x755   : > { %v1613_v53 = vadd.f32 %v2168_v51, %v1612_v52  ;;  %v2408_v54 = vpop.f32.mrb[13].mxu0 }
 0x756   : > { %v1615_v55 = vpop.f32.mrb[14].mxu0 }
 0x757   : > { %v1618_v56 = vmax.f32 %v1613_v53, 0.0  ;;  %v2409_v57 = vpop.f32.mrb[15].mxu0 }
 0x759   : > { %v1619_v58 = vpack.c.bf16 %v1618_v56, %v1618_v56 }
 0x75b   : > { %2427 = vmatmul.mubr.bf16.vlgmr.msra.gmra.mrb[12].mxu1 %v1619_v58 }
 0x75c   : > { %2912 = shalt.err (!%p2909_p10)
}
 0x75d   : > { %s2913_s12 = scalar_lea.hbm %s3694_s23, 128  ;;  %s2917_s17 = scalar_lea.hbm %s3962_s30, 384 }
 0x75e   : > { %p2914_p11 = scmp.ne.s32.totalorder %s3694_s23, %s2913_s12  ;;  %p2918_p6 = scmp.lt.u32.totalorder %s3694_s23, %s3962_s30 }
 0x75f   : > { %p2919_p5 = scmp.lt.u32.totalorder %s2917_s17, %s2913_s12  ;;  %p2921_p12 = scmp.lt.u32.totalorder %s2913_s12, %s3694_s23 }
 0x760   : > { %p2915_p7 = pnand %p2914_p11, %p3964_p1 }
 0x761   : > { %p2920_p8 = por %p2919_p5, %p2918_p6 }
 0x762   : > { %p2916_p4 = pneg %p2915_p7 }
 0x763   : > { %p2922_p13 = por %p2921_p12, %p2920_p8 }
 0x765   : > { %p2923_p0 = pnand %p2922_p13, %p2916_p4 }
 0x767   : > { %2926 = shalt.err (!%p2923_p0)
}
 0x768   : > { %2465 = dma.vmem_to_hbm [thread:$0]  (%p3964_p1), %s3698_s0, 128, %s3694_s23, %s3708_s6  }
 0x769   : > { %s3965_s7 = scalar_lea.vmem [#allocation21], %s3547_s28  ;;  %s3966_s8 = sand.u32 1, %s3252_s29  }
 0x76a   : > { %s1805_s19 = sshll.u32 %s3965_s7, 4  ;;  %s3736_s16 = scalar_lea.sflag [#allocation22], %s3966_s8  ;;  %s1806_s19 = int_to_ptr.vmem [resolvable:$true] %s1805_s19 }
 0x76b   : > { %s2927_s21 = scalar_lea.vmem %s1806_s19, 128  ;;  %s3117_s12 = smov [#allocation21]  }
 0x76c   : > { %p2928_p2 = scmp.ne.s32.totalorder %s1806_s19, %s2927_s21  ;;  %s2931_s17 = sshll.u32 %s3117_s12, 4  ;;  %s2932_s17 = int_to_ptr.vmem [resolvable:$false] %s2931_s17 }
 0x76d   : > { %s2933_s14 = scalar_lea.vmem %s2932_s17, 256  ;;  %p2934_p10 = scmp.lt.s32.totalorder %s1806_s19, %s2932_s17 }
 0x76e   : > { %p2929_p3 = pnand %p2928_p2, %p3964_p1  ;;  %p2935_p11 = scmp.lt.s32.totalorder %s2933_s14, %s2927_s21 }
 0x770   : > { %p2930_p9 = pneg %p2929_p3  ;;  %p2936_p7 = por %p2935_p11, %p2934_p10 }
 0x772   : > { %p2937_p4 = pnand %p2936_p7, %p2930_p9 }
 0x774   : > { %2940 = shalt.err (!%p2937_p4)
}
 0x775   : > { %s2941_s29 = scalar_lea.hbm %s3704_s18, 128  ;;  %s2945_s7 = scalar_lea.hbm %s3963_s5, 384 }
 0x776   : > { %p2942_p6 = scmp.ne.s32.totalorder %s3704_s18, %s2941_s29  ;;  %p2946_p12 = scmp.lt.u32.totalorder %s3704_s18, %s3963_s5 }
 0x777   : > { %p2947_p13 = scmp.lt.u32.totalorder %s2945_s7, %s2941_s29  ;;  %p2949_p2 = scmp.lt.u32.totalorder %s2941_s29, %s3704_s18 }
 0x778   : > { %p2943_p5 = pnand %p2942_p6, %p3964_p1 }
 0x779   : > { %p2948_p0 = por %p2947_p13, %p2946_p12 }
 0x77a   : > { %p2944_p8 = pneg %p2943_p5 }
 0x77b   : > { %p2950_p3 = por %p2949_p2, %p2948_p0 }
 0x77d   : > { %p2951_p9 = pnand %p2950_p3, %p2944_p8 }
 0x77f   : > { %2954 = shalt.err (!%p2951_p9)
}
 0x780   : > { %2467 = dma.vmem_to_hbm [thread:$0]  (%p3964_p1), %s1806_s19, 128, %s3704_s18, %s3736_s16  }
 0x781   : > { %s3967_s14 = sld [smem:[#allocation51_spill]]  ;;  %s3968_s0 = scalar_lea.vmem [#allocation23], %s3547_s28 }
 0x782   : > { %s3764_s29 = sshll.u32 %s3968_s0, 4  ;;  %s3969_s7 = scalar_lea.vmem [#allocation20], %s3547_s28  ;;  %s1819_s29 = int_to_ptr.vmem [resolvable:$true] %s3764_s29 }
 0x783   : > { %s1792_s8 = sshll.u32 %s3969_s7, 4  ;;  %s3970_s11 = sld [smem:[#allocation53_spill]]  ;;  %s1793_s8 = int_to_ptr.vmem [resolvable:$true] %s1792_s8 }
 0x784   : > { %s2955_s15 = scalar_lea.vmem %s1793_s8, 128  ;;  %s3118_s18 = smov [#allocation20]  }
 0x785   : > { %p2956_p10 = scmp.ne.s32.totalorder %s1793_s8, %s2955_s15  ;;  %s2959_s19 = sshll.u32 %s3118_s18, 4  ;;  %s2960_s19 = int_to_ptr.vmem [resolvable:$false] %s2959_s19 }
 0x786   : > { %s2961_s21 = scalar_lea.vmem %s2960_s19, 256  ;;  %p2962_p4 = scmp.lt.s32.totalorder %s1793_s8, %s2960_s19 }
 0x787   : > { %s3760_s23 = scalar_lea.hbm %s3967_s14, %s3688_s9  ;;  %p2957_p11 = pnand %p2956_p10, %p3964_p1 }
 0x788   : > { %p2963_p6 = scmp.lt.s32.totalorder %s2961_s21, %s2955_s15 }
 0x789   : > { %s3772_s13 = scalar_lea.hbm %s3970_s11, %s3688_s9  ;;  %p2958_p7 = pneg %p2957_p11 }
 0x78a   : > { %p2964_p5 = por %p2963_p6, %p2962_p4 }
 0x78c   : > { %p2965_p8 = pnand %p2964_p5, %p2958_p7 }
 0x78e   : > { %2968 = shalt.err (!%p2965_p8)
}
 0x78f   : > { %s2969_s5 = scalar_lea.hbm %s3760_s23, 128  ;;  %s2973_s7 = scalar_lea.hbm %s3967_s14, 384 }
 0x790   : > { %p2970_p12 = scmp.ne.s32.totalorder %s3760_s23, %s2969_s5  ;;  %p2974_p2 = scmp.lt.u32.totalorder %s3760_s23, %s3967_s14 }
 0x791   : > { %p2975_p3 = scmp.lt.u32.totalorder %s2973_s7, %s2969_s5  ;;  %p2977_p10 = scmp.lt.u32.totalorder %s2969_s5, %s3760_s23 }
 0x792   : > { %p2971_p13 = pnand %p2970_p12, %p3964_p1 }
 0x793   : > { %p2976_p9 = por %p2975_p3, %p2974_p2 }
 0x794   : > { %p2972_p0 = pneg %p2971_p13 }
 0x795   : > { %p2978_p11 = por %p2977_p10, %p2976_p9 }
 0x797   : > { %p2979_p7 = pnand %p2978_p11, %p2972_p0 }
 0x799   : > { %2982 = shalt.err (!%p2979_p7)
}
 0x79a   : > { %2466 = dma.vmem_to_hbm [thread:$0]  (%p3964_p1), %s1793_s8, 128, %s3760_s23, %s3708_s6  }
 0x79b   : > { %s2983_s15 = scalar_lea.vmem %s1819_s29, 128  ;;  %s3119_s19 = smov [#allocation23]  }
 0x79c   : > { %p2984_p4 = scmp.ne.s32.totalorder %s1819_s29, %s2983_s15  ;;  %s2987_s21 = sshll.u32 %s3119_s19, 4  ;;  %s2988_s21 = int_to_ptr.vmem [resolvable:$false] %s2987_s21 }
 0x79d   : > { %s2989_s5 = scalar_lea.vmem %s2988_s21, 256  ;;  %p2990_p8 = scmp.lt.s32.totalorder %s1819_s29, %s2988_s21 }
 0x79e   : > { %p2985_p6 = pnand %p2984_p4, %p3964_p1  ;;  %p2991_p12 = scmp.lt.s32.totalorder %s2989_s5, %s2983_s15 }
 0x7a0   : > { %p2986_p5 = pneg %p2985_p6  ;;  %p2992_p13 = por %p2991_p12, %p2990_p8 }
 0x7a2   : > { %p2993_p0 = pnand %p2992_p13, %p2986_p5 }
 0x7a4   : > { %2996 = shalt.err (!%p2993_p0)
}
 0x7a5   : > { %s2997_s6 = scalar_lea.hbm %s3772_s13, 128  ;;  %s3001_s17 = scalar_lea.hbm %s3970_s11, 384 }
 0x7a6   : > { %p2998_p2 = scmp.ne.s32.totalorder %s3772_s13, %s2997_s6  ;;  %p3002_p10 = scmp.lt.u32.totalorder %s3772_s13, %s3970_s11 }
 0x7a7   : > { %p3003_p11 = scmp.lt.u32.totalorder %s3001_s17, %s2997_s6  ;;  %p3005_p4 = scmp.lt.u32.totalorder %s2997_s6, %s3772_s13 }
 0x7a8   : > { %p2999_p3 = pnand %p2998_p2, %p3964_p1 }
 0x7a9   : > { %p3004_p7 = por %p3003_p11, %p3002_p10 }
 0x7aa   : > { %p3000_p9 = pneg %p2999_p3 }
 0x7ab   : > { %p3006_p6 = por %p3005_p4, %p3004_p7 }
 0x7ad   : > { %p3007_p5 = pnand %p3006_p6, %p3000_p9 }
 0x7af   : > { %3010 = shalt.err (!%p3007_p5)
}
 0x7b0   : > { %2468 = dma.vmem_to_hbm [thread:$0]  (%p3964_p1), %s1819_s29, 128, %s3772_s13, %s3736_s16  }
 0x7b1   : > { %s3971_s15 = sld [smem:[#allocation48_spill]]  ;;  %s794_s19 = scalar_lea.vmem [#allocation17], %s3547_s28 }
 0x7b2   : > { %s1766_s21 = sshll.u32 %s794_s19, 4  ;;  %s3972_s23 = sld [smem:[#allocation49_spill]]  ;;  %s3821_s21 = int_to_ptr.vmem [resolvable:$true] %s1766_s21 }
 0x7b3   : > { %s1733_s13 = scalar_lea.sflag [#allocation4], %s3544_s1  ;;  %s3011_s16 = scalar_lea.vmem %s3821_s21, 128 }
 0x7b4   : > { %p3012_p8 = scmp.ne.s32.totalorder %s3821_s21, %s3011_s16  ;;  %s3120_s28 = smov [#allocation17]  }
 0x7b5   : > { %s3015_s29 = sshll.u32 %s3120_s28, 4  ;;  %s3016_s29 = int_to_ptr.vmem [resolvable:$false] %s3015_s29 }
 0x7b6   : > { %p3013_p12 = pnand %p3012_p8, %p3964_p1  ;;  %s3017_s17 = scalar_lea.vmem %s3016_s29, 256 }
 0x7b7   : > { %v2177_v0 = vld [vmem:[%s3971_s15] ss:$0 sm:$0xff]  ;;  %p3018_p0 = scmp.lt.s32.totalorder %s3821_s21, %s3016_s29  ;;  %p3019_p2 = scmp.lt.s32.totalorder %s3017_s17, %s3011_s16 }
 0x7b8   : > { %s3819_s8 = scalar_lea.hbm %s3972_s23, %s3688_s9  ;;  %p3014_p13 = pneg %p3013_p12 }
 0x7b9   : > { %p3020_p3 = por %p3019_p2, %p3018_p0 }
 0x7bb   : > { %p3021_p9 = pnand %p3020_p3, %p3014_p13 }
 0x82e   : > { %v1725_v59 = vpop.f32.mrb[12].mxu1 }
 0x82f   : > { %v1726_v60 = vadd.f32 %v2177_v0, %v1725_v59  ;;  %v2428_v61 = vpop.f32.mrb[13].mxu1 }
 0x830   : > { %v1728_v62 = vpop.f32.mrb[14].mxu1 }
 0x831   : > { %1731 = vst [vmem:[%s794_s19] sm:$0xff] %v1726_v60  ;;  %v2429_v63 = vpop.f32.mrb[15].mxu1 }
 0x832   : > { %3024 = shalt.err (!%p3021_p9)
}
 0x833   : > { %s3025_s1 = scalar_lea.hbm %s3819_s8, 128  ;;  %s3029_s7 = scalar_lea.hbm %s3972_s23, 384 }
 0x834   : > { %p3026_p10 = scmp.ne.s32.totalorder %s3819_s8, %s3025_s1  ;;  %p3030_p4 = scmp.lt.u32.totalorder %s3819_s8, %s3972_s23 }
 0x835   : > { %p3031_p6 = scmp.lt.u32.totalorder %s3029_s7, %s3025_s1  ;;  %p3033_p8 = scmp.lt.u32.totalorder %s3025_s1, %s3819_s8 }
 0x836   : > { %p3027_p11 = pnand %p3026_p10, %p3964_p1 }
 0x837   : > { %p3032_p5 = por %p3031_p6, %p3030_p4 }
 0x838   : > { %p3028_p7 = pneg %p3027_p11 }
 0x839   : > { %p3034_p12 = por %p3033_p8, %p3032_p5 }
 0x83b   : > { %p3035_p13 = pnand %p3034_p12, %p3028_p7 }
 0x83d   : > { %3038 = shalt.err (!%p3035_p13)
}
 0x83e   : > { %2464 = dma.vmem_to_hbm [thread:$0]  (%p3964_p1), %s3821_s21, 128, %s3819_s8, %s1733_s13  }
 0x83f PF: > { %p2536_p0 = scmp.ge.s32.totalorder %s3101_s27, 2  ;;  %s1830_s15 = sand.u32 1, %s3089_s2  }
 0x840   : > { %p3973_p2 = scmp.ne.s32.totalorder %s3943_s22, 0  ;;  %s1831_s19 = scalar_lea.sflag [#allocation4], %s1830_s15 }
 0x842   : > { %p2504_p3 = pnand %p2536_p0, %p3973_p2 }
 0x844   : > { %3076 = dma.done.wait (!%p2504_p3), %s1831_s19, 128  }
 0x845   : > { %3078 = vsyncadd (!%p2504_p3), %s1831_s19, 4294967168  ;;  %s3974_s5 = sadd.s32 4294967294, %s3101_s27  }
 0x846   : > { %s1839_s6 = sand.u32 1, %s3974_s5  }
 0x847   : > { %s1840_s16 = scalar_lea.sflag [#allocation19], %s1839_s6 }
 0x848   : > { %3080 = dma.done.wait (!%p2504_p3), %s1840_s16, 256  }
 0x849   : > { %3082 = vsyncadd (!%p2504_p3), %s1840_s16, 4294967040  ;;  %s1858_s3 = scalar_lea.sflag [#allocation22], %s1839_s6 }
 0x84a   : > { %3084 = dma.done.wait (!%p2504_p3), %s1858_s3, 256  }
 0x84b   : > { %3086 = vsyncadd (!%p2504_p3), %s1858_s3, 4294967040  ;;  %p45_p1 = scmp.ge.s32.totalorder %s3466_s4, 5   ;;  %s3975_s2 = smov %s3093_s25 }
 0x84c   : > { %s3976_s25 = smov %s3097_s26  ;;  %s3977_s26 = smov %s3477_s10 }
 0x84d   : > { %s3978_s27 = smov %s3466_s4  ;;  %47 = sbr.rel (!%p45_p1) target bundleno = 36 (0x24), region = 229 }
 0x854   :  { %1872 = vsyncpa [#allocation3], 1 }
 0x855   :  { %1874 = vsyncpa [#allocation3 + $0x1], 1 }
 0x856   :  { %1875 = vsyncpa [#allocation6], 1 }
 0x857   :  { %1876 = vsyncpa [#allocation9], 1 }
 0x858   :  { %1877 = vsyncpa [#allocation12], 1 }
 0x859   :  { %1878 = vsyncpa [#allocation15], 1 }
 0x85a   :  { %1879 = vsyncpa [#allocation4], 1 }
 0x85b   :  { %1881 = vsyncpa [#allocation4 + $0x1], 1 }
 0x85c   :  { %1882 = vsyncpa [#allocation19], 1 }
 0x85d   :  { %1884 = vsyncpa [#allocation19 + $0x1], 1 }
 0x85e   :  { %1885 = vsyncpa [#allocation22], 1 }
 0x85f   :  { %1887 = vsyncpa [#allocation22 + $0x1], 1 }

</bundles_post_ra>
